<compile_context>
chip_gen: v6e
topology: v6e:2x2x1
jax: 0.10.0
libtpu: 0.0.40
codegen_flags: <defaults>
</compile_context>

<pallas_src>
import jax
import jax.numpy as jnp
from jax.experimental import pallas as pl
from jax.experimental.pallas import tpu as pltpu


def _round_up(x, m):
    return ((x + m - 1) // m) * m


def _mlp_head_kernel(x_ref, w1_ref, b1_ref, w2_ref, b2_ref, w3_ref, b3_ref, o_ref):
    # x_ref : (tm, Din) tile of rows.  Weights/biases are resident full blocks.
    x = x_ref[...]

    # Linear 1 (+ bias), f32 accumulation on the MXU.
    h = jnp.dot(x, w1_ref[...], preferred_element_type=jnp.float32)
    h = h + b1_ref[...].astype(jnp.float32)
    # LeakyReLU(0.2): one mul + one max on the VPU.
    h = jnp.maximum(h, 0.2 * h)

    # Linear 2 (+ bias).  Cast back to weight dtype so bf16 stays bf16 on the MXU.
    h = jnp.dot(h.astype(w2_ref.dtype), w2_ref[...], preferred_element_type=jnp.float32)
    h = h + b2_ref[...].astype(jnp.float32)
    h = jnp.maximum(h, 0.2 * h)

    # Linear 3 (+ bias).
    e = jnp.dot(h.astype(w3_ref.dtype), w3_ref[...], preferred_element_type=jnp.float32)
    e = e + b3_ref[...].astype(jnp.float32)

    # F.normalize(p=2, dim=1): x / max(||x||_2, 1e-12) == x * rsqrt(max(sumsq, 1e-24)).
    sumsq = jnp.sum(e * e, axis=-1, keepdims=True)
    inv = jax.lax.rsqrt(jnp.maximum(sumsq, 1e-24))
    o_ref[...] = (e * inv).astype(o_ref.dtype)


def mlp_projection_head_pallas(x, params, *, block_rows=512):
    """x: (N, dim_in) -> (N, project_dims), L2-normalized over the feature dim."""
    w1, b1 = params["w1"], params["b1"]
    w2, b2 = params["w2"], params["b2"]
    w3, b3 = params["w3"], params["b3"]

    N, Din = x.shape
    Dp = w3.shape[1]

    # Row tiling: biggest tile up to block_rows, sublane(8)-aligned.
    tm = min(block_rows, _round_up(N, 8))
    Np = _round_up(N, tm)
    if Np != N:
        # Zero rows normalize to zero; sliced off below.  (For production sizes
        # pick N % tm == 0 so no pad/slice HBM pass is needed.)
        x = jnp.pad(x, ((0, Np - N), (0, 0)))

    grid = (Np // tm,)

    itemsize = x.dtype.itemsize
    flops = 2 * Np * (Din * Din + Din * Dp + Dp * Dp)
    bytes_accessed = (
        Np * Din * itemsize
        + Np * Dp * itemsize
        + sum(int(a.size) * a.dtype.itemsize for a in (w1, b1, w2, b2, w3, b3))
    )

    out = pl.pallas_call(
        _mlp_head_kernel,
        out_shape=jax.ShapeDtypeStruct((Np, Dp), x.dtype),
        grid_spec=pltpu.PrefetchScalarGridSpec(
            num_scalar_prefetch=0,
            grid=grid,
            in_specs=[
                pl.BlockSpec((tm, Din), lambda i: (i, 0)),   # x tile
                pl.BlockSpec((Din, Din), lambda i: (0, 0)),  # w1
                pl.BlockSpec((1, Din), lambda i: (0, 0)),    # b1
                pl.BlockSpec((Din, Dp), lambda i: (0, 0)),   # w2
                pl.BlockSpec((1, Dp), lambda i: (0, 0)),     # b2
                pl.BlockSpec((Dp, Dp), lambda i: (0, 0)),    # w3
                pl.BlockSpec((1, Dp), lambda i: (0, 0)),     # b3
            ],
            out_specs=pl.BlockSpec((tm, Dp), lambda i: (i, 0)),
        ),
        compiler_params=pltpu.CompilerParams(
            dimension_semantics=("parallel",)),
        cost_estimate=pl.CostEstimate(
            flops=flops, transcendentals=Np, bytes_accessed=bytes_accessed),
    )(x, w1, b1, w2, b2, w3, b3)

    return out[:N] if Np != N else out


def init_mlp_projection_head_params(key, dim_in=256, project_dims=256, dtype=jnp.float32):
    """PyTorch-Linear-style init. Weights stored transposed as (in, out)."""
    def linear(k, fan_in, fan_out):
        kw, kb = jax.random.split(k)
        s = float(fan_in) ** -0.5
        w = jax.random.uniform(kw, (fan_in, fan_out), jnp.float32, -s, s)
        b = jax.random.uniform(kb, (1, fan_out), jnp.float32, -s, s)
        return w.astype(dtype), b.astype(dtype)

    k1, k2, k3 = jax.random.split(key, 3)
    w1, b1 = linear(k1, dim_in, dim_in)
    w2, b2 = linear(k2, dim_in, project_dims)
    w3, b3 = linear(k3, project_dims, project_dims)
    return {"w1": w1, "b1": b1, "w2": w2, "b2": b2, "w3": w3, "b3": b3}


# ----- pure-JAX reference (matches the PyTorch forward) -----
def _mlp_projection_head_ref(x, p):
    x = x.astype(jnp.float32)
    h = x @ p["w1"].astype(jnp.float32) + p["b1"].astype(jnp.float32)
    h = jnp.where(h >= 0, h, 0.2 * h)
    h = h @ p["w2"].astype(jnp.float32) + p["b2"].astype(jnp.float32)
    h = jnp.where(h >= 0, h, 0.2 * h)
    e = h @ p["w3"].astype(jnp.float32) + p["b3"].astype(jnp.float32)
    nrm = jnp.maximum(jnp.sqrt(jnp.sum(e * e, axis=1, keepdims=True)), 1e-12)
    return e / nrm


if __name__ == "__main__":
    key = jax.random.PRNGKey(0)

    # Config 1: lane-dense dims (multiples of 128), multi-step grid + row padding.
    # Config 2: small / odd dims exercising full-array (non-128-multiple) blocks.
    configs = [
        dict(N=1000, dim_in=128, project_dims=128),
        dict(N=20, dim_in=48, project_dims=32),
    ]

    for cfg in configs:
        key, kp, kx = jax.random.split(key, 3)
        params = init_mlp_projection_head_params(kp, cfg["dim_in"], cfg["project_dims"])
        x = jax.random.normal(kx, (cfg["N"], cfg["dim_in"]), jnp.float32)

        out = jax.block_until_ready(mlp_projection_head_pallas(x, params))
        ref = _mlp_projection_head_ref(x, params)

        assert out.shape == ref.shape, (out.shape, ref.shape)
        assert jnp.allclose(out, ref, atol=1e-5, rtol=1e-5), \
            f"mismatch vs reference for cfg {cfg}"

    print("KERNEL_OK")
</pallas_src>

<mosaic_0001>
module attributes {stable_mosaic.version = 11 : i64} {
  func.func @_mlp_head_kernel(%arg0: i32, %arg1: memref<512x128xf32, #tpu.memory_space<vmem>>, %arg2: memref<128x128xf32, #tpu.memory_space<vmem>>, %arg3: memref<1x128xf32, #tpu.memory_space<vmem>>, %arg4: memref<128x128xf32, #tpu.memory_space<vmem>>, %arg5: memref<1x128xf32, #tpu.memory_space<vmem>>, %arg6: memref<128x128xf32, #tpu.memory_space<vmem>>, %arg7: memref<1x128xf32, #tpu.memory_space<vmem>>, %arg8: memref<512x128xf32, #tpu.memory_space<vmem>>) attributes {dimension_semantics = [#tpu.dimension_semantics<parallel>], iteration_bounds = array<i64: 2>, scalar_prefetch = 0 : i64, scratch_operands = 0 : i64, tpu.core_type = #tpu.core_type<tc>, window_params = [{transform_indices = @transform_0, window_bounds = array<i64: 512, 128>}, {pipeline_mode = #tpu.pipeline_mode<synchronous>, transform_indices = @transform_1, window_bounds = array<i64: 128, 128>}, {pipeline_mode = #tpu.pipeline_mode<synchronous>, transform_indices = @transform_2, window_bounds = array<i64: 1, 128>}, {pipeline_mode = #tpu.pipeline_mode<synchronous>, transform_indices = @transform_3, window_bounds = array<i64: 128, 128>}, {pipeline_mode = #tpu.pipeline_mode<synchronous>, transform_indices = @transform_4, window_bounds = array<i64: 1, 128>}, {pipeline_mode = #tpu.pipeline_mode<synchronous>, transform_indices = @transform_5, window_bounds = array<i64: 128, 128>}, {pipeline_mode = #tpu.pipeline_mode<synchronous>, transform_indices = @transform_6, window_bounds = array<i64: 1, 128>}, {transform_indices = @transform_7, window_bounds = array<i64: 512, 128>}]} {
    %c0 = arith.constant 0 : index
    %c0_0 = arith.constant 0 : index
    %0 = vector.load %arg1[%c0, %c0_0] : memref<512x128xf32, #tpu.memory_space<vmem>>, vector<512x128xf32>
    %c0_1 = arith.constant 0 : index
    %c0_2 = arith.constant 0 : index
    %1 = vector.load %arg2[%c0_1, %c0_2] : memref<128x128xf32, #tpu.memory_space<vmem>>, vector<128x128xf32>
    %cst = arith.constant dense<0.000000e+00> : vector<512x128xf32>
    %2 = tpu.matmul %0, %1, %cst {dimension_numbers = #tpu.dot_dimension_numbers<[1], [0], [0], [1], [0, 0, 1, 1], [], []>} : vector<512x128xf32>, vector<128x128xf32>, vector<512x128xf32> -> vector<512x128xf32>
    %c0_3 = arith.constant 0 : index
    %c0_4 = arith.constant 0 : index
    %3 = vector.load %arg3[%c0_3, %c0_4] : memref<1x128xf32, #tpu.memory_space<vmem>>, vector<1x128xf32>
    %4 = vector.broadcast %3 : vector<1x128xf32> to vector<512x128xf32>
    %5 = arith.addf %2, %4 : vector<512x128xf32>
    %cst_5 = arith.constant 2.000000e-01 : f32
    %6 = vector.broadcast %cst_5 : f32 to vector<512x128xf32>
    %7 = arith.mulf %6, %5 : vector<512x128xf32>
    %8 = arith.maximumf %5, %7 : vector<512x128xf32>
    %c0_6 = arith.constant 0 : index
    %c0_7 = arith.constant 0 : index
    %9 = vector.load %arg4[%c0_6, %c0_7] : memref<128x128xf32, #tpu.memory_space<vmem>>, vector<128x128xf32>
    %cst_8 = arith.constant dense<0.000000e+00> : vector<512x128xf32>
    %10 = tpu.matmul %8, %9, %cst_8 {dimension_numbers = #tpu.dot_dimension_numbers<[1], [0], [0], [1], [0, 0, 1, 1], [], []>} : vector<512x128xf32>, vector<128x128xf32>, vector<512x128xf32> -> vector<512x128xf32>
    %c0_9 = arith.constant 0 : index
    %c0_10 = arith.constant 0 : index
    %11 = vector.load %arg5[%c0_9, %c0_10] : memref<1x128xf32, #tpu.memory_space<vmem>>, vector<1x128xf32>
    %12 = vector.broadcast %11 : vector<1x128xf32> to vector<512x128xf32>
    %13 = arith.addf %10, %12 : vector<512x128xf32>
    %cst_11 = arith.constant 2.000000e-01 : f32
    %14 = vector.broadcast %cst_11 : f32 to vector<512x128xf32>
    %15 = arith.mulf %14, %13 : vector<512x128xf32>
    %16 = arith.maximumf %13, %15 : vector<512x128xf32>
    %c0_12 = arith.constant 0 : index
    %c0_13 = arith.constant 0 : index
    %17 = vector.load %arg6[%c0_12, %c0_13] : memref<128x128xf32, #tpu.memory_space<vmem>>, vector<128x128xf32>
    %cst_14 = arith.constant dense<0.000000e+00> : vector<512x128xf32>
    %18 = tpu.matmul %16, %17, %cst_14 {dimension_numbers = #tpu.dot_dimension_numbers<[1], [0], [0], [1], [0, 0, 1, 1], [], []>} : vector<512x128xf32>, vector<128x128xf32>, vector<512x128xf32> -> vector<512x128xf32>
    %c0_15 = arith.constant 0 : index
    %c0_16 = arith.constant 0 : index
    %19 = vector.load %arg7[%c0_15, %c0_16] : memref<1x128xf32, #tpu.memory_space<vmem>>, vector<1x128xf32>
    %20 = vector.broadcast %19 : vector<1x128xf32> to vector<512x128xf32>
    %21 = arith.addf %18, %20 : vector<512x128xf32>
    %22 = arith.mulf %21, %21 : vector<512x128xf32>
    %cst_17 = arith.constant dense<0.000000e+00> : vector<512xf32>
    %23 = vector.multi_reduction <add>, %22, %cst_17 [1] : vector<512x128xf32> to vector<512xf32>
    %24 = vector.shape_cast %23 : vector<512xf32> to vector<512x1xf32>
    %cst_18 = arith.constant 1.000000e-24 : f32
    %25 = vector.broadcast %cst_18 : f32 to vector<512x1xf32>
    %26 = arith.maximumf %24, %25 : vector<512x1xf32>
    %27 = math.rsqrt %26 : vector<512x1xf32>
    %28 = vector.broadcast %27 : vector<512x1xf32> to vector<512x128xf32>
    %29 = arith.mulf %21, %28 : vector<512x128xf32>
    %c0_19 = arith.constant 0 : index
    %c0_20 = arith.constant 0 : index
    %30 = vector.load %arg8[%c0_19, %c0_20] : memref<512x128xf32, #tpu.memory_space<vmem>>, vector<512x128xf32>
    tpu.vector_store %arg8[%c0_19, %c0_20], %29 {strides = array<i32>} : memref<512x128xf32, #tpu.memory_space<vmem>>, vector<512x128xf32>,
    return
  }
  func.func @transform_0(%arg0: i32) -> (i32, i32) {
    %c0_i32 = arith.constant 0 : i32
    %c0_i32_0 = arith.constant 0 : i32
    return %arg0, %c0_i32 : i32, i32
  }
  func.func @transform_1(%arg0: i32) -> (i32, i32) {
    %c0_i32 = arith.constant 0 : i32
    %c0_i32_0 = arith.constant 0 : i32
    %c0_i32_1 = arith.constant 0 : i32
    return %c0_i32, %c0_i32_0 : i32, i32
  }
  func.func @transform_2(%arg0: i32) -> (i32, i32) {
    %c0_i32 = arith.constant 0 : i32
    %c0_i32_0 = arith.constant 0 : i32
    %c0_i32_1 = arith.constant 0 : i32
    return %c0_i32, %c0_i32_0 : i32, i32
  }
  func.func @transform_3(%arg0: i32) -> (i32, i32) {
    %c0_i32 = arith.constant 0 : i32
    %c0_i32_0 = arith.constant 0 : i32
    %c0_i32_1 = arith.constant 0 : i32
    return %c0_i32, %c0_i32_0 : i32, i32
  }
  func.func @transform_4(%arg0: i32) -> (i32, i32) {
    %c0_i32 = arith.constant 0 : i32
    %c0_i32_0 = arith.constant 0 : i32
    %c0_i32_1 = arith.constant 0 : i32
    return %c0_i32, %c0_i32_0 : i32, i32
  }
  func.func @transform_5(%arg0: i32) -> (i32, i32) {
    %c0_i32 = arith.constant 0 : i32
    %c0_i32_0 = arith.constant 0 : i32
    %c0_i32_1 = arith.constant 0 : i32
    return %c0_i32, %c0_i32_0 : i32, i32
  }
  func.func @transform_6(%arg0: i32) -> (i32, i32) {
    %c0_i32 = arith.constant 0 : i32
    %c0_i32_0 = arith.constant 0 : i32
    %c0_i32_1 = arith.constant 0 : i32
    return %c0_i32, %c0_i32_0 : i32, i32
  }
  func.func @transform_7(%arg0: i32) -> (i32, i32) {
    %c0_i32 = arith.constant 0 : i32
    %c0_i32_0 = arith.constant 0 : i32
    return %arg0, %c0_i32 : i32, i32
  }
}

</mosaic_0001>

<bundles_post_ra>
// kernel: tpu_custom_call.1
= control target key start
LH: loop header
LB: loop body
LE: loop exit
PB: predicated region body
PF: predicated region fallthrough
CT: control target
= control target key end

     0   :  { %s4512_s0 = inlined_call_operand.hbm [shape: f32[1024,128], index: 0, kind: input, shape index: {}]   ;;  %s4513_s1 = inlined_call_operand.hbm [shape: f32[128,128], index: 1, kind: input, shape index: {}]   ;;  %s4514_s2 = inlined_call_operand.vmem [shape: f32[1,128], index: 2, kind: input, shape index: {}]   ;;  %s4515_s3 = inlined_call_operand.hbm [shape: f32[128,128], index: 3, kind: input, shape index: {}]   ;;  %s4516_s4 = inlined_call_operand.vmem [shape: f32[1,128], index: 4, kind: input, shape index: {}]   ;;  %s4517_s5 = inlined_call_operand.hbm [shape: f32[128,128], index: 5, kind: input, shape index: {}]   ;;  %s4518_s6 = inlined_call_operand.vmem [shape: f32[1,128], index: 6, kind: input, shape index: {}]   ;;  %s4519_s7 = inlined_call_operand.hbm [shape: f32[1024,128], index: 7, kind: output, shape index: {}]  }
   0x1   :  { %4541 = sst [smem:[#allocation30_spill]] %s4513_s1 }
   0x2   :  { %12 = vsyncpa [#allocation3], 0 }
   0x3   :  { %14 = vsyncpa [#allocation3 + $0x1], 0 }
   0x4   :  { %15 = vsyncpa [#allocation6], 0 }
   0x5   :  { %16 = vsyncpa [#allocation9], 0 }
   0x6   :  { %17 = vsyncpa [#allocation4], 0 }
   0x7   :  { %19 = vsyncpa [#allocation4 + $0x1], 0  ;;  %s3570_s24 = smov 0   ;;  %s3572_s25 = smov 0  }
   0x8   :  { %s3574_s26 = smov 0   ;;  %s3576_s27 = smov 0  }
   0x9 LB: > { %s3591_s28 = sadd.s32 4294967295, %s3519_s27   ;;  %s2451_s29 = sadd.s32 4294967294, %s3519_s27   ;;  %s3519_s27 = sphi %s3576_s27, %s4593_s27   ;;  %s3515_s26 = sphi %s3574_s26, %s4592_s26   ;;  %s3511_s25 = sphi %s3572_s25, %s4591_s25   ;;  %s3507_s24 = sphi %s3570_s24, %s4590_s24  }
   0xa   : > { %p45_p0 = scmp.ne.s32.totalorder %s3511_s25, %s3507_s24  ;;  %p4520_p1 = scmp.eq.s32.totalorder %s3591_s28, 0 }
   0xb   : > { %p195_p2 = scmp.eq.s32.totalorder %s3591_s28, 1  ;;  %p201_p3 = scmp.eq.s32.totalorder %s2451_s29, 1 }
   0xc   : > { %p3600_p4 = por %p4520_p1, %p45_p0  ;;  %p2452_p5 = scmp.ge.s32.totalorder %s3519_s27, 1 }
   0xd   : > { %p3605_p6 = por %p201_p3, %p45_p0  ;;  %p208_p7 = scmp.lt.s32.totalorder %s3519_s27, 3 }
   0xe   : > { %s4542_s30 = scalar_select %p3600_p4, 1, 0 }
   0xf   : > { %s4543_s8 = scalar_select %p3605_p6, 1, 0 }
  0x10   : > { %p3610_p8 = pnand %p2452_p5, %p208_p7  ;;  %s3521_s10 = smov [#allocation5]  }
  0x11   : > { %s220_s11 = sshll.u32 %s3521_s10, 4  ;;  %s3522_s13 = smov [#allocation7]   ;;  %s221_s11 = int_to_ptr.vmem [resolvable:$true] %s220_s11 }
  0x12   : > { %s4544_s9 = scalar_select %p3610_p8, 1, 0 }
  0x13   : > { %p3148_p9 = pneg %p3610_p8  ;;  %s236_s14 = sshll.u32 %s3522_s13, 4  ;;  %s237_s14 = int_to_ptr.vmem [resolvable:$true] %s236_s14 }
  0x14   : > { %s3523_s15 = smov [#allocation8]   ;;  %s3352_s17 = scalar_lea.vmem %s221_s11, 2048 }
  0x15   : > { %p3619_p11 = pnand %p3148_p9, %p4520_p1  ;;  %s252_s16 = sshll.u32 %s3523_s15, 4  ;;  %s253_s16 = int_to_ptr.vmem [resolvable:$true] %s252_s16 }
  0x16   : > { %p3353_p13 = scmp.ne.s32.totalorder %s221_s11, %s3352_s17  ;;  %p3360_p5 = scmp.lt.s32.totalorder %s221_s11, %s221_s11 }
  0x17   : > { %p3343_p12 = pneg %p3619_p11  ;;  %p3361_p7 = scmp.lt.s32.totalorder %s3352_s17, %s3352_s17 }
  0x19   : > { %p3355_p0 = pnand %p3353_p13, %p3343_p12  ;;  %p3362_p9 = por %p3361_p7, %p3360_p5 }
  0x1b   : > { %p3356_p3 = pneg %p3355_p0 }
  0x1d   : > { %p3363_p10 = pnand %p3362_p9, %p3356_p3 }
  0x1f   : > { %3366 = shalt.err (!%p3363_p10)
}
  0x20   : > { %s4521_s18 = smov 128   ;;  %s4522_s19 = smov 8  }
  0x21   : > { %s4546_s1 = sld [smem:[#allocation30_spill]]  ;;  %s3378_s22 = scalar_lea.vmem %s237_s14, 2048 }
  0x22   : > { %p3379_p13 = scmp.ne.s32.totalorder %s237_s14, %s3378_s22  ;;  %p3386_p3 = scmp.lt.s32.totalorder %s237_s14, %s237_s14 }
  0x23   : > { %p3387_p10 = scmp.lt.s32.totalorder %s3378_s22, %s3378_s22 }
  0x24   : > { %p3381_p0 = pnand %p3379_p13, %p3343_p12 }
  0x25   : > { %p3388_p7 = por %p3387_p10, %p3386_p3 }
  0x26   : > { %p3382_p5 = pneg %p3381_p0 }
  0x27   : > { %3151 = dma.hbm_to_vmem [thread:$0]  (!%p3619_p11), %s4546_s1, 2048, %s221_s11, [#allocation6], %s4521_s18, %s4521_s18, %s4522_s19  }
  0x28   : > { %p3389_p9 = pnand %p3388_p7, %p3382_p5 }
  0x2a   : > { %3392 = shalt.err (!%p3389_p9)
}
  0x2b   : > { %3154 = dma.hbm_to_vmem [thread:$0]  (!%p3619_p11), %s4515_s3, 2048, %s237_s14, [#allocation6], %s4521_s18, %s4521_s18, %s4522_s19  }
  0x2c   : > { %s3404_s10 = scalar_lea.vmem %s253_s16, 2048  ;;  %p3412_p3 = scmp.lt.s32.totalorder %s253_s16, %s253_s16 }
  0x2d   : > { %p3405_p1 = scmp.ne.s32.totalorder %s253_s16, %s3404_s10  ;;  %p3413_p5 = scmp.lt.s32.totalorder %s3404_s10, %s3404_s10 }
  0x2f   : > { %p3407_p13 = pnand %p3405_p1, %p3343_p12  ;;  %p3414_p10 = por %p3413_p5, %p3412_p3 }
  0x31   : > { %p3408_p0 = pneg %p3407_p13 }
  0x33   : > { %p3415_p7 = pnand %p3414_p10, %p3408_p0 }
  0x35   : > { %3418 = shalt.err (!%p3415_p7)
}
  0x36   : > { %3157 = dma.hbm_to_vmem [thread:$0]  (!%p3619_p11), %s4517_s5, 2048, %s253_s16, [#allocation9], %s4521_s18, %s4521_s18, %s4522_s19  }
  0x37   : > { %s3659_s14 = sadd.s32 1, %s3519_s27   ;;  %s32_s15 = sadd.s32 1, %s3515_s26 }
  0x38   : > { %s29_s12 = ssub.s32 %s3519_s27, %s3659_s14  ;;  %p39_p12 = scmp.ne.s32.totalorder %s3515_s26, %s3511_s25 }
  0x39   : > { %p30_p1 = scmp.eq.s32.totalorder %s29_s12, 0  ;;  %p40_p9 = scmp.eq.s32.totalorder %s3519_s27, 0 }
  0x3a   : > { %p3169_p13 = scmp.lt.s32.totalorder %s3519_s27, 2  ;;  %p3673_p3 = por %p195_p2, %p39_p12 }
  0x3b   : > { %s3669_s17 = scalar_select %p30_p1, %s3515_s26, %s32_s15  }
  0x3c   : > { %p41_p0 = por %p40_p9, %p39_p12  ;;  %s269_s21 = sand.u32 1, %s3515_s26  }
  0x3d   : > { %s4547_s20 = scalar_select %p3673_p3, 1, 0 }
  0x3e   : > { %s2474_s22 = sshll.u32 %s3519_s27, 13  ;;  %s2457_s16 = sshll.u32 %s269_s21, 9 }
  0x3f   : > { %s3682_s10 = scalar_lea.hbm %s4512_s0, %s2474_s22  ;;  %s273_s11 = scalar_lea.vmem [#allocation2], %s2457_s16 }
  0x40   : > { %s280_s13 = sshll.u32 %s273_s11, 4  ;;  %p3684_p11 = pnand %p3169_p13, %p41_p0  ;;  %s3688_s13 = int_to_ptr.vmem [resolvable:$true] %s280_s13 }
  0x41   : > { %s3690_s15 = scalar_lea.sflag [#allocation3], %s269_s21  ;;  %s3419_s18 = scalar_lea.hbm %s3682_s10, 8192 }
  0x42   : > { %p3420_p2 = scmp.ne.s32.totalorder %s3682_s10, %s3419_s18  ;;  %p3421_p5 = pneg %p3684_p11 }
  0x43   : > { %s3424_s16 = scalar_lea.hbm %s4512_s0, 16384  ;;  %p3425_p1 = scmp.lt.s32.totalorder %s3682_s10, %s4512_s0 }
  0x44   : > { %p3422_p10 = pnand %p3421_p5, %p3420_p2  ;;  %p3426_p12 = scmp.lt.s32.totalorder %s3424_s16, %s3419_s18 }
  0x46   : > { %p3423_p7 = pneg %p3422_p10  ;;  %p3427_p9 = por %p3426_p12, %p3425_p1 }
  0x48   : > { %p3428_p13 = pnand %p3427_p9, %p3423_p7 }
  0x4a   : > { %3431 = shalt.err (!%p3428_p13)
}
  0x4b   : > { %s3432_s21 = scalar_lea.vmem %s3688_s13, 8192  ;;  %s3526_s19 = smov [#allocation2]  }
  0x4c   : > { %p3433_p0 = scmp.ne.s32.totalorder %s3688_s13, %s3432_s21  ;;  %s3437_s1 = sshll.u32 %s3526_s19, 4  ;;  %s3438_s1 = int_to_ptr.vmem [resolvable:$false] %s3437_s1 }
  0x4d   : > { %s3439_s22 = scalar_lea.vmem %s3438_s1, 16384  ;;  %p3440_p10 = scmp.lt.s32.totalorder %s3688_s13, %s3438_s1 }
  0x4e   : > { %p3435_p6 = pnand %p3433_p0, %p3421_p5  ;;  %p3441_p3 = scmp.lt.s32.totalorder %s3439_s22, %s3432_s21 }
  0x50   : > { %p3436_p2 = pneg %p3435_p6  ;;  %p3442_p4 = por %p3441_p3, %p3440_p10 }
  0x52   : > { %p3443_p8 = pnand %p3442_p4, %p3436_p2 }
  0x54   : > { %3446 = shalt.err (!%p3443_p8)
}
  0x55   : > { %s4549_s18 = smov 8   ;;  %s4550_s23 = smov 128  }
  0x56   : > { %3161 = dma.hbm_to_vmem [thread:$0]  (!%p3684_p11), %s3682_s10, 8192, %s3688_s13, %s3690_s15, %s4550_s23, %s4550_s23, %s4549_s18  }
  0x57   : > { %p4551_p6 = scmp.ne.s32.totalorder %s4544_s9, 0 }
  0x59   : > { %292 = sbr.rel (%p4551_p6) target bundleno = 1037 (0x40d), region = 48 }
  0x5e   : > { %s3717_s19 = sand.u32 1, %s3511_s25   ;;  %p4552_p4 = scmp.ne.s32.totalorder %s4542_s30, 0 }
  0x5f   : > { %s2461_s1 = sshll.u32 %s3717_s19, 9  ;;  %s295_s16 = scalar_lea.sflag [#allocation3], %s3717_s19 }
  0x60   : > { %s3723_s12 = scalar_lea.vmem [#allocation2], %s2461_s1 }
  0x61   : > { %3490 = dma.done.wait (%p4552_p4), %s295_s16, 8192  }
  0x62   : > { %3492 = vsyncadd (%p4552_p4), %s295_s16, 4294959104  ;;  %p4553_p8 = scmp.eq.s32.totalorder %s3591_s28, 0 }
  0x64   : > { %3494 = dma.done.wait (%p4553_p8), [#allocation6], 4096   ;;  %p4554_p3 = pmov %p4553_p8 }
  0x66   : > { %3496 = vsyncadd (%p4554_p3), [#allocation6], 4294963200  ;;  %p4555_p11 = pmov %p4554_p3 }
  0x67   : > { %p4556_p5 = pmov %p4554_p3 }
  0x68   : > { %3498 = dma.done.wait (%p4555_p11), [#allocation9], 2048  }
  0x69   : > { %3500 = vsyncadd (%p4556_p5), [#allocation9], 4294965248  ;;  %v422_v0 = vld [vmem:[#allocation5 + $0x78] sm:$0xff]  ;;  %v421_v1 = vld [vmem:[#allocation5 + $0x70] sm:$0xff]  ;;  %s4333_s11 = scalar_lea.vmem [#allocation10], %s2461_s1  ;;  %s2475_s21 = sshll.u32 %s3591_s28, 13 }
  0x6a   : > { %2716 = vmatprep.subr.mxu0 %v422_v0  ;;  %3100 = vmatprep.subr.mxu1 %v422_v0  ;;  %v420_v2 = vld [vmem:[#allocation5 + $0x68] sm:$0xff]  ;;  %v419_v3 = vld [vmem:[#allocation5 + $0x60] sm:$0xff]  ;;  %v418_v5 = vld [vmem:[#allocation5 + $0x58] sm:$0xff]  ;;  %s2349_s22 = sshll.u32 %s4333_s11, 4  ;;  %s4464_s1 = scalar_lea.hbm %s4519_s7, %s2475_s21  ;;  %s4466_s22 = int_to_ptr.vmem [resolvable:$true] %s2349_s22 }
  0x6b   : > { %2717 = vmatpush3.msra.mxu0 %v422_v0  ;;  %3116 = vmatpush3.msra.mxu1 %v422_v0  ;;  %v343_v4 = vld [vmem:[%s3723_s12] sm:$0xff]  ;;  %v417_v6 = vld [vmem:[#allocation5 + $0x50] sm:$0xff]  ;;  %v416_v7 = vld [vmem:[#allocation5 + $0x48] sm:$0xff]  ;;  %s2336_s28 = scalar_lea.sflag [#allocation4], %s3717_s19  ;;  %s3447_s16 = scalar_lea.vmem %s4466_s22, 8192 }
  0x6c   : > { %2718 = vmatprep.subr.mxu0 %v421_v1  ;;  %3101 = vmatprep.subr.mxu1 %v421_v1  ;;  %v415_v8 = vld [vmem:[#allocation5 + $0x40] sm:$0xff]  ;;  %v414_v9 = vld [vmem:[#allocation5 + $0x38] sm:$0xff]  ;;  %v413_v10 = vld [vmem:[#allocation5 + $0x30] sm:$0xff]  ;;  %p3448_p7 = scmp.ne.s32.totalorder %s4466_s22, %s3447_s16  ;;  %p4587_p1 = scmp.ne.s32.totalorder %s4547_s20, 0 }
  0x6d   : > { %2719 = vmatpush3.msra.mxu0 %v421_v1  ;;  %3117 = vmatpush3.msra.mxu1 %v421_v1  ;;  %v412_v11 = vld [vmem:[#allocation5 + $0x28] sm:$0xff]  ;;  %v411_v12 = vld [vmem:[#allocation5 + $0x20] sm:$0xff]  ;;  %v410_v13 = vld [vmem:[#allocation5 + $0x18] sm:$0xff] }
  0x6e   : > { %2720 = vmatprep.subr.mxu0 %v420_v2  ;;  %3102 = vmatprep.subr.mxu1 %v420_v2  ;;  %v409_v14 = vld [vmem:[#allocation5 + $0x10] sm:$0xff]  ;;  %v408_v15 = vld [vmem:[#allocation5 + $0x8] sm:$0xff]  ;;  %v407_v16 = vld [vmem:[#allocation5] sm:$0xff]  ;;  %p3449_p12 = pnand %p3448_p7, %p4587_p1 }
  0x6f   : > { %2721 = vmatpush3.msra.mxu0 %v420_v2  ;;  %2748 = vmatprep.mubr.f32.mxu0 %v343_v4  ;;  %v344_v17 = vld [vmem:[%s3723_s12 + $0x8] sm:$0xff]  ;;  %v345_v18 = vld [vmem:[%s3723_s12 + $0x10] sm:$0xff]  ;;  %v375_v19 = vld [vmem:[%s3723_s12 + $0x100] sm:$0xff] }
  0x70   : > { %2722 = vmatprep.subr.mxu0 %v419_v3  ;;  %3118 = vmatpush3.msra.mxu1 %v420_v2  ;;  %v376_v20 = vld [vmem:[%s3723_s12 + $0x108] sm:$0xff]  ;;  %v958_v21 = vld [vmem:[#allocation7 + $0x78] sm:$0xff]  ;;  %v377_v22 = vld [vmem:[%s3723_s12 + $0x110] sm:$0xff]  ;;  %p3450_p9 = pneg %p3449_p12 }
  0x71   : > { %2723 = vmatpush3.msra.mxu0 %v419_v3  ;;  %3103 = vmatprep.subr.mxu1 %v419_v3  ;;  %v346_v23 = vld [vmem:[%s3723_s12 + $0x18] sm:$0xff]  ;;  %v957_v24 = vld [vmem:[#allocation7 + $0x70] sm:$0xff]  ;;  %v347_v25 = vld [vmem:[%s3723_s12 + $0x20] sm:$0xff] }
  0x72   : > { %2724 = vmatprep.subr.mxu0 %v418_v5  ;;  %3119 = vmatpush3.msra.mxu1 %v419_v3  ;;  %v378_v26 = vld [vmem:[%s3723_s12 + $0x118] sm:$0xff]  ;;  %v956_v27 = vld [vmem:[#allocation7 + $0x68] sm:$0xff]  ;;  %v379_v28 = vld [vmem:[%s3723_s12 + $0x120] sm:$0xff] }
  0x73   : > { %2725 = vmatpush3.msra.mxu0 %v418_v5  ;;  %3104 = vmatprep.subr.mxu1 %v418_v5  ;;  %v348_v29 = vld [vmem:[%s3723_s12 + $0x28] sm:$0xff]  ;;  %v955_v30 = vld [vmem:[#allocation7 + $0x60] sm:$0xff]  ;;  %v349_v31 = vld [vmem:[%s3723_s12 + $0x30] sm:$0xff] }
  0x74   : > { %2726 = vmatprep.subr.mxu0 %v417_v6  ;;  %3120 = vmatpush3.msra.mxu1 %v418_v5  ;;  %v380_v32 = vld [vmem:[%s3723_s12 + $0x128] sm:$0xff]  ;;  %v954_v33 = vld [vmem:[#allocation7 + $0x58] sm:$0xff]  ;;  %v381_v34 = vld [vmem:[%s3723_s12 + $0x130] sm:$0xff] }
  0x75   : > { %2727 = vmatpush3.msra.mxu0 %v417_v6  ;;  %3105 = vmatprep.subr.mxu1 %v417_v6  ;;  %v350_v35 = vld [vmem:[%s3723_s12 + $0x38] sm:$0xff]  ;;  %v953_v36 = vld [vmem:[#allocation7 + $0x50] sm:$0xff]  ;;  %v351_v37 = vld [vmem:[%s3723_s12 + $0x40] sm:$0xff] }
  0x76   : > { %2728 = vmatprep.subr.mxu0 %v416_v7  ;;  %3121 = vmatpush3.msra.mxu1 %v417_v6  ;;  %v382_v38 = vld [vmem:[%s3723_s12 + $0x138] sm:$0xff]  ;;  %v952_v39 = vld [vmem:[#allocation7 + $0x48] sm:$0xff]  ;;  %v383_v40 = vld [vmem:[%s3723_s12 + $0x140] sm:$0xff] }
  0x77   : > { %2729 = vmatpush3.msra.mxu0 %v416_v7  ;;  %3106 = vmatprep.subr.mxu1 %v416_v7  ;;  %v352_v41 = vld [vmem:[%s3723_s12 + $0x48] sm:$0xff]  ;;  %v951_v42 = vld [vmem:[#allocation7 + $0x40] sm:$0xff]  ;;  %v353_v43 = vld [vmem:[%s3723_s12 + $0x50] sm:$0xff] }
  0x78   : > { %2730 = vmatprep.subr.mxu0 %v415_v8  ;;  %3122 = vmatpush3.msra.mxu1 %v416_v7  ;;  %v384_v44 = vld [vmem:[%s3723_s12 + $0x148] sm:$0xff]  ;;  %v950_v45 = vld [vmem:[#allocation7 + $0x38] sm:$0xff]  ;;  %v385_v46 = vld [vmem:[%s3723_s12 + $0x150] sm:$0xff] }
  0x79   : > { %2731 = vmatpush3.msra.mxu0 %v415_v8  ;;  %3107 = vmatprep.subr.mxu1 %v415_v8  ;;  %v354_v47 = vld [vmem:[%s3723_s12 + $0x58] sm:$0xff]  ;;  %v949_v48 = vld [vmem:[#allocation7 + $0x30] sm:$0xff]  ;;  %v355_v49 = vld [vmem:[%s3723_s12 + $0x60] sm:$0xff] }
  0x7a   : > { %2732 = vmatprep.subr.mxu0 %v414_v9  ;;  %3123 = vmatpush3.msra.mxu1 %v415_v8  ;;  %v386_v50 = vld [vmem:[%s3723_s12 + $0x158] sm:$0xff]  ;;  %v948_v51 = vld [vmem:[#allocation7 + $0x28] sm:$0xff]  ;;  %v387_v52 = vld [vmem:[%s3723_s12 + $0x160] sm:$0xff] }
  0x7b   : > { %2733 = vmatpush3.msra.mxu0 %v414_v9  ;;  %3108 = vmatprep.subr.mxu1 %v414_v9  ;;  %v356_v53 = vld [vmem:[%s3723_s12 + $0x68] sm:$0xff]  ;;  %v947_v54 = vld [vmem:[#allocation7 + $0x20] sm:$0xff]  ;;  %v357_v55 = vld [vmem:[%s3723_s12 + $0x70] sm:$0xff] }
  0x7c   : > { %2734 = vmatprep.subr.mxu0 %v413_v10  ;;  %3124 = vmatpush3.msra.mxu1 %v414_v9  ;;  %v388_v56 = vld [vmem:[%s3723_s12 + $0x168] sm:$0xff]  ;;  %v946_v57 = vld [vmem:[#allocation7 + $0x18] sm:$0xff]  ;;  %v389_v58 = vld [vmem:[%s3723_s12 + $0x170] sm:$0xff] }
  0x7d   : > { %2735 = vmatpush3.msra.mxu0 %v413_v10  ;;  %3109 = vmatprep.subr.mxu1 %v413_v10  ;;  %v358_v59 = vld [vmem:[%s3723_s12 + $0x78] sm:$0xff]  ;;  %v945_v60 = vld [vmem:[#allocation7 + $0x10] sm:$0xff]  ;;  %v359_v61 = vld [vmem:[%s3723_s12 + $0x80] sm:$0xff] }
  0x7e   : > { %2736 = vmatprep.subr.mxu0 %v412_v11  ;;  %3125 = vmatpush3.msra.mxu1 %v413_v10  ;;  %v390_v62 = vld [vmem:[%s3723_s12 + $0x178] sm:$0xff]  ;;  %v391_v63 = vld [vmem:[%s3723_s12 + $0x180] sm:$0xff]  ;;  %v360_v0 = vld [vmem:[%s3723_s12 + $0x88] sm:$0xff] }
  0x7f   : > { %2737 = vmatpush3.msra.mxu0 %v412_v11  ;;  %3110 = vmatprep.subr.mxu1 %v412_v11  ;;  %v361_v1 = vld [vmem:[%s3723_s12 + $0x90] sm:$0xff]  ;;  %v392_v2 = vld [vmem:[%s3723_s12 + $0x188] sm:$0xff]  ;;  %v362_v4 = vld [vmem:[%s3723_s12 + $0x98] sm:$0xff] }
  0x80   : > { %2738 = vmatprep.subr.mxu0 %v411_v12  ;;  %3126 = vmatpush3.msra.mxu1 %v412_v11  ;;  %v393_v3 = vld [vmem:[%s3723_s12 + $0x190] sm:$0xff]  ;;  %v363_v5 = vld [vmem:[%s3723_s12 + $0xa0] sm:$0xff]  ;;  %v394_v6 = vld [vmem:[%s3723_s12 + $0x198] sm:$0xff] }
  0x81   : > { %2739 = vmatpush3.msra.mxu0 %v411_v12  ;;  %3111 = vmatprep.subr.mxu1 %v411_v12  ;;  %v395_v7 = vld [vmem:[%s3723_s12 + $0x1a0] sm:$0xff]  ;;  %v364_v8 = vld [vmem:[%s3723_s12 + $0xa8] sm:$0xff]  ;;  %v365_v9 = vld [vmem:[%s3723_s12 + $0xb0] sm:$0xff] }
  0x82   : > { %2740 = vmatprep.subr.mxu0 %v410_v13  ;;  %3127 = vmatpush3.msra.mxu1 %v411_v12  ;;  %v396_v10 = vld [vmem:[%s3723_s12 + $0x1a8] sm:$0xff]  ;;  %v397_v11 = vld [vmem:[%s3723_s12 + $0x1b0] sm:$0xff]  ;;  %v366_v12 = vld [vmem:[%s3723_s12 + $0xb8] sm:$0xff] }
  0x83   : > { %2741 = vmatpush3.msra.mxu0 %v410_v13  ;;  %3112 = vmatprep.subr.mxu1 %v410_v13 }
  0x84   : > { %2742 = vmatprep.subr.mxu0 %v409_v14  ;;  %3128 = vmatpush3.msra.mxu1 %v410_v13  ;;  %v367_v13 = vld [vmem:[%s3723_s12 + $0xc0] sm:$0xff] }
  0x85   : > { %2743 = vmatpush3.msra.mxu0 %v409_v14  ;;  %3113 = vmatprep.subr.mxu1 %v409_v14 }
  0x86   : > { %2744 = vmatprep.subr.mxu0 %v408_v15  ;;  %3129 = vmatpush3.msra.mxu1 %v409_v14  ;;  %v398_v14 = vld [vmem:[%s3723_s12 + $0x1b8] sm:$0xff] }
  0x87   : > { %2745 = vmatpush3.msra.mxu0 %v408_v15  ;;  %3114 = vmatprep.subr.mxu1 %v408_v15 }
  0x88   : > { %2746 = vmatprep.subr.mxu0 %v407_v16  ;;  %3130 = vmatpush3.msra.mxu1 %v408_v15  ;;  %v399_v15 = vld [vmem:[%s3723_s12 + $0x1c0] sm:$0xff] }
  0x89   : > { %2747 = vmatpush3.msra.mxu0 %v407_v16  ;;  %3115 = vmatprep.subr.mxu1 %v407_v16 }
  0x8a   : > { %2749 = vmatmul.mubr.f32.vlgmr.msra.gmra.mxu0 %v344_v17  ;;  %3131 = vmatpush3.msra.mxu1 %v407_v16  ;;  %v368_v16 = vld [vmem:[%s3723_s12 + $0xc8] sm:$0xff]  ;;  %v369_v17 = vld [vmem:[%s3723_s12 + $0xd0] sm:$0xff] }
  0x8b   : > { %2751 = vmatprep.mubr.f32.mxu0 %v345_v18  ;;  %2796 = vmatprep.mubr.f32.mxu1 %v375_v19  ;;  %v400_v18 = vld [vmem:[%s3723_s12 + $0x1c8] sm:$0xff]  ;;  %v401_v19 = vld [vmem:[%s3723_s12 + $0x1d0] sm:$0xff] }
  0x8c   : > { %2797 = vmatmul.mubr.f32.vlgmr.msra.gmra.mxu1 %v376_v20  ;;  %2844 = vmatprep.subr.mxu1 %v958_v21  ;;  %v370_v20 = vld [vmem:[%s3723_s12 + $0xd8] sm:$0xff] }
  0x8d   : > { %2799 = vmatprep.mubr.f32.mxu1 %v377_v22  ;;  %2845 = vmatpush3.msra.mxu1 %v958_v21  ;;  %v371_v21 = vld [vmem:[%s3723_s12 + $0xe0] sm:$0xff]  ;;  %v402_v22 = vld [vmem:[%s3723_s12 + $0x1d8] sm:$0xff] }
  0x8e   : > { %2752 = vmatmul.mubr.f32.gmra.mxu0 %v346_v23  ;;  %2846 = vmatprep.subr.mxu1 %v957_v24  ;;  %v403_v23 = vld [vmem:[%s3723_s12 + $0x1e0] sm:$0xff] }
  0x8f   : > { %2754 = vmatprep.mubr.f32.mxu0 %v347_v25  ;;  %2847 = vmatpush3.msra.mxu1 %v957_v24  ;;  %v372_v24 = vld [vmem:[%s3723_s12 + $0xe8] sm:$0xff]  ;;  %v373_v25 = vld [vmem:[%s3723_s12 + $0xf0] sm:$0xff] }
  0x90   : > { %2800 = vmatmul.mubr.f32.gmra.mxu1 %v378_v26  ;;  %2848 = vmatprep.subr.mxu1 %v956_v27  ;;  %v404_v26 = vld [vmem:[%s3723_s12 + $0x1e8] sm:$0xff] }
  0x91   : > { %2802 = vmatprep.mubr.f32.mxu1 %v379_v28  ;;  %2849 = vmatpush3.msra.mxu1 %v956_v27  ;;  %v405_v27 = vld [vmem:[%s3723_s12 + $0x1f0] sm:$0xff]  ;;  %v374_v28 = vld [vmem:[%s3723_s12 + $0xf8] sm:$0xff] }
  0x92   : > { %2755 = vmatmul.mubr.f32.gmra.mxu0 %v348_v29  ;;  %2850 = vmatprep.subr.mxu1 %v955_v30  ;;  %v406_v29 = vld [vmem:[%s3723_s12 + $0x1f8] sm:$0xff]  ;;  %s3527_s12 = smov [#allocation10]  }
  0x93   : > { %2757 = vmatprep.mubr.f32.mxu0 %v349_v31  ;;  %2851 = vmatpush3.msra.mxu1 %v955_v30  ;;  %v944_v30 = vld [vmem:[#allocation7 + $0x8] sm:$0xff]  ;;  %v943_v31 = vld [vmem:[#allocation7] sm:$0xff]  ;;  %s3451_s30 = sshll.u32 %s3527_s12, 4  ;;  %s3452_s30 = int_to_ptr.vmem [resolvable:$false] %s3451_s30 }
  0x94   : > { %2803 = vmatmul.mubr.f32.gmra.mxu1 %v380_v32  ;;  %2852 = vmatprep.subr.mxu1 %v954_v33  ;;  %v3804_v32 = vld [vmem:[%s4514_s2] ss:$0 sm:$0xff]  ;;  %s3453_s9 = scalar_lea.vmem %s3452_s30, 16384  ;;  %p3454_p13 = scmp.lt.s32.totalorder %s4466_s22, %s3452_s30 }
  0x95   : > { %2805 = vmatprep.mubr.f32.mxu1 %v381_v34  ;;  %2853 = vmatpush3.msra.mxu1 %v954_v33  ;;  %p3455_p0 = scmp.lt.s32.totalorder %s3453_s9, %s3447_s16 }
  0x96   : > { %2758 = vmatmul.mubr.f32.gmra.mxu0 %v350_v35  ;;  %2854 = vmatprep.subr.mxu1 %v953_v36 }
  0x97   : > { %2760 = vmatprep.mubr.f32.mxu0 %v351_v37  ;;  %2855 = vmatpush3.msra.mxu1 %v953_v36  ;;  %p3456_p2 = por %p3455_p0, %p3454_p13 }
  0x98   : > { %2806 = vmatmul.mubr.f32.gmra.mxu1 %v382_v38  ;;  %2856 = vmatprep.subr.mxu1 %v952_v39 }
  0x99   : > { %2808 = vmatprep.mubr.f32.mxu1 %v383_v40  ;;  %2857 = vmatpush3.msra.mxu1 %v952_v39  ;;  %p3457_p10 = pnand %p3456_p2, %p3450_p9 }
  0x9a   : > { %2761 = vmatmul.mubr.f32.gmra.mxu0 %v352_v41  ;;  %2858 = vmatprep.subr.mxu1 %v951_v42 }
  0x9b   : > { %2763 = vmatprep.mubr.f32.mxu0 %v353_v43  ;;  %2859 = vmatpush3.msra.mxu1 %v951_v42 }
  0x9c   : > { %2809 = vmatmul.mubr.f32.gmra.mxu1 %v384_v44  ;;  %2860 = vmatprep.subr.mxu1 %v950_v45 }
  0x9d   : > { %2811 = vmatprep.mubr.f32.mxu1 %v385_v46  ;;  %2861 = vmatpush3.msra.mxu1 %v950_v45  ;;  %v1494_v45 = vld [vmem:[#allocation8 + $0x78] sm:$0xff]  ;;  %v1493_v46 = vld [vmem:[#allocation8 + $0x70] sm:$0xff] }
  0x9e   : > { %2764 = vmatmul.mubr.f32.gmra.mxu0 %v354_v47  ;;  %2862 = vmatprep.subr.mxu1 %v949_v48 }
  0x9f   : > { %2766 = vmatprep.mubr.f32.mxu0 %v355_v49  ;;  %2863 = vmatpush3.msra.mxu1 %v949_v48 }
  0xa0   : > { %2812 = vmatmul.mubr.f32.gmra.mxu1 %v386_v50  ;;  %2864 = vmatprep.subr.mxu1 %v948_v51 }
  0xa1   : > { %2814 = vmatprep.mubr.f32.mxu1 %v387_v52  ;;  %2865 = vmatpush3.msra.mxu1 %v948_v51 }
  0xa2   : > { %2767 = vmatmul.mubr.f32.gmra.mxu0 %v356_v53  ;;  %2866 = vmatprep.subr.mxu1 %v947_v54  ;;  %v1492_v53 = vld [vmem:[#allocation8 + $0x68] sm:$0xff] }
  0xa3   : > { %2769 = vmatprep.mubr.f32.mxu0 %v357_v55  ;;  %2867 = vmatpush3.msra.mxu1 %v947_v54 }
  0xa4   : > { %2815 = vmatmul.mubr.f32.gmra.mxu1 %v388_v56  ;;  %2868 = vmatprep.subr.mxu1 %v946_v57 }
  0xa5   : > { %2817 = vmatprep.mubr.f32.mxu1 %v389_v58  ;;  %2869 = vmatpush3.msra.mxu1 %v946_v57  ;;  %v1491_v58 = vld [vmem:[#allocation8 + $0x60] sm:$0xff] }
  0xa6   : > { %2770 = vmatmul.mubr.f32.gmra.mxu0 %v358_v59  ;;  %2870 = vmatprep.subr.mxu1 %v945_v60 }
  0xa7   : > { %2772 = vmatprep.mubr.f32.mxu0 %v359_v61  ;;  %2871 = vmatpush3.msra.mxu1 %v945_v60 }
  0xa8   : > { %2818 = vmatmul.mubr.f32.gmra.mxu1 %v390_v62  ;;  %2872 = vmatprep.subr.mxu1 %v944_v30 }
  0xa9   : > { %2820 = vmatprep.mubr.f32.mxu1 %v391_v63  ;;  %2873 = vmatpush3.msra.mxu1 %v944_v30 }
  0xaa   : > { %2773 = vmatmul.mubr.f32.gmra.mxu0 %v360_v0  ;;  %2874 = vmatprep.subr.mxu1 %v943_v31 }
  0xab   : > { %2775 = vmatprep.mubr.f32.mxu0 %v361_v1  ;;  %2875 = vmatpush3.msra.mxu1 %v943_v31  ;;  %v1490_v1 = vld [vmem:[#allocation8 + $0x58] sm:$0xff] }
  0xac   : > { %2821 = vmatmul.mubr.f32.gmra.mxu1 %v392_v2  ;;  %2972 = vmatprep.subr.mxu0 %v1494_v45 }
  0xad   : > { %2823 = vmatprep.mubr.f32.mxu1 %v393_v3  ;;  %2973 = vmatpush3.msra.mxu0 %v1494_v45 }
  0xae   : > { %2776 = vmatmul.mubr.f32.gmra.mxu0 %v362_v4  ;;  %2974 = vmatprep.subr.mxu0 %v1493_v46 }
  0xaf   : > { %2778 = vmatprep.mubr.f32.mxu0 %v363_v5  ;;  %2975 = vmatpush3.msra.mxu0 %v1493_v46  ;;  %v1489_v5 = vld [vmem:[#allocation8 + $0x50] sm:$0xff] }
  0xb0   : > { %2824 = vmatmul.mubr.f32.gmra.mxu1 %v394_v6  ;;  %2976 = vmatprep.subr.mxu0 %v1492_v53 }
  0xb1   : > { %2826 = vmatprep.mubr.f32.mxu1 %v395_v7  ;;  %2977 = vmatpush3.msra.mxu0 %v1492_v53 }
  0xb2   : > { %2779 = vmatmul.mubr.f32.gmra.mxu0 %v364_v8  ;;  %2978 = vmatprep.subr.mxu0 %v1491_v58 }
  0xb3   : > { %2781 = vmatprep.mubr.f32.mxu0 %v365_v9  ;;  %2979 = vmatpush3.msra.mxu0 %v1491_v58 }
  0xb4   : > { %2827 = vmatmul.mubr.f32.gmra.mxu1 %v396_v10  ;;  %2980 = vmatprep.subr.mxu0 %v1490_v1 }
  0xb5   : > { %2829 = vmatprep.mubr.f32.mxu1 %v397_v11  ;;  %2981 = vmatpush3.msra.mxu0 %v1490_v1 }
  0xb6   : > { %2782 = vmatmul.mubr.f32.gmra.mxu0 %v366_v12  ;;  %v1488_v12 = vld [vmem:[#allocation8 + $0x48] sm:$0xff]  ;;  %2982 = vmatprep.subr.mxu0 %v1489_v5 }
  0xb7   : > { %2784 = vmatprep.mubr.f32.mxu0 %v367_v13  ;;  %2983 = vmatpush3.msra.mxu0 %v1489_v5 }
  0xb8   : > { %2830 = vmatmul.mubr.f32.gmra.mxu1 %v398_v14  ;;  %2984 = vmatprep.subr.mxu0 %v1488_v12 }
  0xb9   : > { %2832 = vmatprep.mubr.f32.mxu1 %v399_v15  ;;  %2985 = vmatpush3.msra.mxu0 %v1488_v12 }
  0xba   : > { %2785 = vmatmul.mubr.f32.gmra.mxu0 %v368_v16  ;;  %v1487_v16 = vld [vmem:[#allocation8 + $0x40] sm:$0xff] }
  0xbb   : > { %2787 = vmatprep.mubr.f32.mxu0 %v369_v17  ;;  %2986 = vmatprep.subr.mxu0 %v1487_v16 }
  0xbc   : > { %2833 = vmatmul.mubr.f32.gmra.mxu1 %v400_v18  ;;  %2987 = vmatpush3.msra.mxu0 %v1487_v16 }
  0xbd   : > { %2835 = vmatprep.mubr.f32.mxu1 %v401_v19 }
  0xbe   : > { %2788 = vmatmul.mubr.f32.gmra.mxu0 %v370_v20 }
  0xbf   : > { %2790 = vmatprep.mubr.f32.mxu0 %v371_v21 }
  0xc0   : > { %2836 = vmatmul.mubr.f32.gmra.mxu1 %v402_v22 }
  0xc1   : > { %2838 = vmatprep.mubr.f32.mxu1 %v403_v23  ;;  %v1486_v23 = vld [vmem:[#allocation8 + $0x38] sm:$0xff] }
  0xc2   : > { %2791 = vmatmul.mubr.f32.gmra.mxu0 %v372_v24  ;;  %2988 = vmatprep.subr.mxu0 %v1486_v23 }
  0xc3   : > { %2793 = vmatprep.mubr.f32.mxu0 %v373_v25  ;;  %2989 = vmatpush3.msra.mxu0 %v1486_v23 }
  0xc4   : > { %2839 = vmatmul.mubr.f32.gmra.mxu1 %v404_v26 }
  0xc5   : > { %2841 = vmatprep.mubr.f32.mxu1 %v405_v27  ;;  %v1485_v27 = vld [vmem:[#allocation8 + $0x30] sm:$0xff] }
  0xc6   : > { %2794 = vmatmul.mubr.f32.gmra.mxu0 %v374_v28  ;;  %2990 = vmatprep.subr.mxu0 %v1485_v27 }
  0xc7   : > { %2991 = vmatpush3.msra.mxu0 %v1485_v27 }
  0xc8   : > { %2842 = vmatmul.mubr.f32.gmra.mxu1 %v406_v29 }
 0x14a   : > { %v2750_v33 = vpop.f32.mrf.mxu0 }
 0x14b   : > { %v502_v34 = vadd.f32 %v2750_v33, %v3804_v32 }
 0x14c   : > { %v496_v35 = vpop.f32.mrf.mxu0  ;;  %v3807_v36 = vpop.f32.mrf.mxu1 }
 0x14d   : > { %v497_v37 = vadd.f32 %v3804_v32, %v496_v35  ;;  %v816_v38 = vmul.f32 0.2, %v502_v34  ;;  %v1484_v35 = vld [vmem:[#allocation8 + $0x28] sm:$0xff] }
 0x14e   : > { %v2753_v39 = vpop.f32.mrf.mxu0  ;;  %v3810_v40 = vpop.f32.mrf.mxu1  ;;  %2992 = vmatprep.subr.mxu0 %v1484_v35 }
 0x14f   : > { %v815_v41 = vmul.f32 0.2, %v497_v37  ;;  %v512_v42 = vadd.f32 %v2753_v39, %v3804_v32  ;;  %v880_v49 = vmax.f32 %v502_v34, %v816_v38  ;;  %2993 = vmatpush3.msra.mxu0 %v1484_v35 }
 0x150   : > { %v506_v43 = vpop.f32.mrf.mxu0  ;;  %v3813_v44 = vpop.f32.mrf.mxu1 }
 0x151   : > { %v879_v47 = vmax.f32 %v497_v37, %v815_v41  ;;  %v507_v48 = vadd.f32 %v3804_v32, %v506_v43  ;;  %v818_v50 = vmul.f32 0.2, %v512_v42  ;;  %v1483_v41 = vld [vmem:[#allocation8 + $0x20] sm:$0xff] }
 0x152   : > { %v2756_v51 = vpop.f32.mrf.mxu0  ;;  %v3816_v52 = vpop.f32.mrf.mxu1  ;;  %2994 = vmatprep.subr.mxu0 %v1483_v41 }
 0x153   : > { %v817_v54 = vmul.f32 0.2, %v507_v48  ;;  %v522_v55 = vadd.f32 %v2756_v51, %v3804_v32  ;;  %2876 = vmatprep.mubr.f32.mxu1 %v879_v47  ;;  %v882_v61 = vmax.f32 %v512_v42, %v818_v50  ;;  %2995 = vmatpush3.msra.mxu0 %v1483_v41 }
 0x154   : > { %v516_v56 = vpop.f32.mrf.mxu0  ;;  %2877 = vmatmul.mubr.f32.vlgmr.msra.gmra.mxu1 %v880_v49  ;;  %v3819_v57 = vpop.f32.mrf.mxu1  ;;  %v1482_v49 = vld [vmem:[#allocation8 + $0x18] sm:$0xff] }
 0x155   : > { %v881_v59 = vmax.f32 %v507_v48, %v817_v54  ;;  %v517_v60 = vadd.f32 %v3804_v32, %v516_v56  ;;  %v820_v62 = vmul.f32 0.2, %v522_v55  ;;  %v1481_v54 = vld [vmem:[#allocation8 + $0x10] sm:$0xff]  ;;  %2996 = vmatprep.subr.mxu0 %v1482_v49 }
 0x156   : > { %v2759_v63 = vpop.f32.mrf.mxu0  ;;  %v3822_v0 = vpop.f32.mrf.mxu1  ;;  %2997 = vmatpush3.msra.mxu0 %v1482_v49 }
 0x157   : > { %v819_v2 = vmul.f32 0.2, %v517_v60  ;;  %v532_v3 = vadd.f32 %v2759_v63, %v3804_v32  ;;  %2879 = vmatprep.mubr.f32.mxu1 %v881_v59  ;;  %v884_v8 = vmax.f32 %v522_v55, %v820_v62  ;;  %2998 = vmatprep.subr.mxu0 %v1481_v54 }
 0x158   : > { %v526_v4 = vpop.f32.mrf.mxu0  ;;  %2880 = vmatmul.mubr.f32.gmra.mxu1 %v882_v61  ;;  %v3826_v11 = vpop.f32.mrf.mxu1  ;;  %2999 = vmatpush3.msra.mxu0 %v1481_v54 }
 0x159   : > { %v883_v6 = vmax.f32 %v517_v60, %v819_v2  ;;  %v527_v7 = vadd.f32 %v3804_v32, %v526_v4  ;;  %v822_v9 = vmul.f32 0.2, %v532_v3 }
 0x15a   : > { %v2762_v10 = vpop.f32.mrf.mxu0  ;;  %v3830_v22 = vpop.f32.mrf.mxu1 }
 0x15b   : > { %v821_v13 = vmul.f32 0.2, %v527_v7  ;;  %v542_v14 = vadd.f32 %v2762_v10, %v3804_v32  ;;  %2882 = vmatprep.mubr.f32.mxu1 %v883_v6  ;;  %v886_v19 = vmax.f32 %v532_v3, %v822_v9 }
 0x15c   : > { %v536_v15 = vpop.f32.mrf.mxu0  ;;  %2883 = vmatmul.mubr.f32.gmra.mxu1 %v884_v8  ;;  %v3834_v34 = vpop.f32.mrf.mxu1 }
 0x15d   : > { %v885_v17 = vmax.f32 %v527_v7, %v821_v13  ;;  %v537_v18 = vadd.f32 %v3804_v32, %v536_v15  ;;  %v824_v20 = vmul.f32 0.2, %v542_v14 }
 0x15e   : > { %v2765_v21 = vpop.f32.mrf.mxu0  ;;  %v3838_v48 = vpop.f32.mrf.mxu1 }
 0x15f   : > { %v823_v24 = vmul.f32 0.2, %v537_v18  ;;  %v552_v25 = vadd.f32 %v2765_v21, %v3804_v32  ;;  %2885 = vmatprep.mubr.f32.mxu1 %v885_v17  ;;  %v888_v30 = vmax.f32 %v542_v14, %v824_v20 }
 0x160   : > { %v546_v26 = vpop.f32.mrf.mxu0  ;;  %2886 = vmatmul.mubr.f32.gmra.mxu1 %v886_v19  ;;  %v3842_v61 = vpop.f32.mrf.mxu1 }
 0x161   : > { %v887_v28 = vmax.f32 %v537_v18, %v823_v24  ;;  %v547_v29 = vadd.f32 %v3804_v32, %v546_v26  ;;  %v826_v31 = vmul.f32 0.2, %v552_v25 }
 0x162   : > { %v2768_v33 = vpop.f32.mrf.mxu0  ;;  %v3846_v7 = vpop.f32.mrf.mxu1 }
 0x163   : > { %v825_v37 = vmul.f32 0.2, %v547_v29  ;;  %v562_v38 = vadd.f32 %v2768_v33, %v3804_v32  ;;  %2888 = vmatprep.mubr.f32.mxu1 %v887_v28  ;;  %v890_v45 = vmax.f32 %v552_v25, %v826_v31 }
 0x164   : > { %v556_v39 = vpop.f32.mrf.mxu0  ;;  %2889 = vmatmul.mubr.f32.gmra.mxu1 %v888_v30  ;;  %v3850_v17 = vpop.f32.mrf.mxu1 }
 0x165   : > { %v889_v42 = vmax.f32 %v547_v29, %v825_v37  ;;  %v557_v43 = vadd.f32 %v3804_v32, %v556_v39  ;;  %v828_v46 = vmul.f32 0.2, %v562_v38 }
 0x166   : > { %v2771_v47 = vpop.f32.mrf.mxu0  ;;  %v3854_v27 = vpop.f32.mrf.mxu1 }
 0x167   : > { %v827_v50 = vmul.f32 0.2, %v557_v43  ;;  %v572_v51 = vadd.f32 %v2771_v47, %v3804_v32  ;;  %2891 = vmatprep.mubr.f32.mxu1 %v889_v42  ;;  %v892_v58 = vmax.f32 %v562_v38, %v828_v46 }
 0x168   : > { %v566_v53 = vpop.f32.mrf.mxu0  ;;  %2892 = vmatmul.mubr.f32.gmra.mxu1 %v890_v45  ;;  %v3858_v39 = vpop.f32.mrf.mxu1 }
 0x169   : > { %v891_v55 = vmax.f32 %v557_v43, %v827_v50  ;;  %v567_v56 = vadd.f32 %v3804_v32, %v566_v53  ;;  %v830_v59 = vmul.f32 0.2, %v572_v51 }
 0x16a   : > { %v2774_v60 = vpop.f32.mrf.mxu0 }
 0x16b   : > { %v829_v62 = vmul.f32 0.2, %v567_v56  ;;  %v582_v63 = vadd.f32 %v2774_v60, %v3804_v32  ;;  %2894 = vmatprep.mubr.f32.mxu1 %v891_v55  ;;  %v894_v4 = vmax.f32 %v572_v51, %v830_v59  ;;  %v3862_v51 = vpop.f32.mrf.mxu1 }
 0x16c   : > { %v576_v1 = vpop.f32.mrf.mxu0  ;;  %2895 = vmatmul.mubr.f32.gmra.mxu1 %v892_v58 }
 0x16d   : > { %v893_v2 = vmax.f32 %v567_v56, %v829_v62  ;;  %v577_v3 = vadd.f32 %v3804_v32, %v576_v1  ;;  %v832_v5 = vmul.f32 0.2, %v582_v63 }
 0x16e   : > { %v2777_v6 = vpop.f32.mrf.mxu0 }
 0x16f   : > { %v831_v8 = vmul.f32 0.2, %v577_v3  ;;  %v592_v9 = vadd.f32 %v2777_v6, %v3804_v32  ;;  %2897 = vmatprep.mubr.f32.mxu1 %v893_v2  ;;  %v896_v14 = vmax.f32 %v582_v63, %v832_v5  ;;  %v3866_v63 = vpop.f32.mrf.mxu1  ;;  %v657_v6 = vadd.f32 %v3804_v32, %v3810_v40 }
 0x170   : > { %v586_v10 = vpop.f32.mrf.mxu0  ;;  %2898 = vmatmul.mubr.f32.gmra.mxu1 %v894_v4 }
 0x171   : > { %v895_v12 = vmax.f32 %v577_v3, %v831_v8  ;;  %v587_v13 = vadd.f32 %v3804_v32, %v586_v10  ;;  %v834_v15 = vmul.f32 0.2, %v592_v9 }
 0x172   : > { %v2780_v16 = vpop.f32.mrf.mxu0 }
 0x173   : > { %v833_v18 = vmul.f32 0.2, %v587_v13  ;;  %v602_v19 = vadd.f32 %v2780_v16, %v3804_v32  ;;  %2900 = vmatprep.mubr.f32.mxu1 %v895_v12  ;;  %v898_v24 = vmax.f32 %v592_v9, %v834_v15  ;;  %v3872_v12 = vpop.f32.mrf.mxu1 }
 0x174   : > { %v596_v20 = vpop.f32.mrf.mxu0  ;;  %2901 = vmatmul.mubr.f32.gmra.mxu1 %v896_v14 }
 0x175   : > { %v897_v21 = vmax.f32 %v587_v13, %v833_v18  ;;  %v597_v23 = vadd.f32 %v3804_v32, %v596_v20  ;;  %v836_v25 = vmul.f32 0.2, %v602_v19  ;;  %v667_v20 = vadd.f32 %v3804_v32, %v3816_v52 }
 0x176   : > { %v2783_v26 = vpop.f32.mrf.mxu0  ;;  %v672_v52 = vadd.f32 %v3813_v44, %v3804_v32 }
 0x177   : > { %v835_v28 = vmul.f32 0.2, %v597_v23  ;;  %v612_v29 = vadd.f32 %v2783_v26, %v3804_v32  ;;  %2903 = vmatprep.mubr.f32.mxu1 %v897_v21  ;;  %v900_v35 = vmax.f32 %v602_v19, %v836_v25  ;;  %v847_v19 = vmul.f32 0.2, %v657_v6 }
 0x178   : > { %v606_v30 = vpop.f32.mrf.mxu0  ;;  %2904 = vmatmul.mubr.f32.gmra.mxu1 %v898_v24  ;;  %v3880_v24 = vpop.f32.mrf.mxu1 }
 0x179   : > { %v899_v31 = vmax.f32 %v597_v23, %v835_v28  ;;  %v607_v33 = vadd.f32 %v3804_v32, %v606_v30  ;;  %v838_v37 = vmul.f32 0.2, %v612_v29  ;;  %v662_v23 = vadd.f32 %v3807_v36, %v3804_v32 }
 0x17a   : > { %v2786_v38 = vpop.f32.mrf.mxu0  ;;  %v911_v28 = vmax.f32 %v657_v6, %v847_v19  ;;  %v677_v30 = vadd.f32 %v3804_v32, %v3822_v0  ;;  %v682_v0 = vadd.f32 %v3819_v57, %v3804_v32  ;;  %v707_v57 = vadd.f32 %v3804_v32, %v3846_v7 }
 0x17b   : > { %v837_v41 = vmul.f32 0.2, %v607_v33  ;;  %v622_v42 = vadd.f32 %v2786_v38, %v3804_v32  ;;  %2906 = vmatprep.mubr.f32.mxu1 %v899_v31  ;;  %v902_v47 = vmax.f32 %v612_v29, %v838_v37  ;;  %v849_v29 = vmul.f32 0.2, %v667_v20 }
 0x17c   : > { %v616_v43 = vpop.f32.mrf.mxu0  ;;  %2907 = vmatmul.mubr.f32.gmra.mxu1 %v900_v35  ;;  %v3886_v35 = vpop.f32.mrf.mxu1  ;;  %v851_v37 = vmul.f32 0.2, %v677_v30  ;;  %v687_v38 = vadd.f32 %v3804_v32, %v3830_v22  ;;  %v727_v6 = vadd.f32 %v3804_v32, %v3862_v51 }
 0x17d   : > { %v901_v45 = vmax.f32 %v607_v33, %v837_v41  ;;  %v617_v46 = vadd.f32 %v3804_v32, %v616_v43  ;;  %v840_v49 = vmul.f32 0.2, %v622_v42  ;;  %v848_v33 = vmul.f32 0.2, %v662_v23 }
 0x17e   : > { %v2789_v50 = vpop.f32.mrf.mxu0  ;;  %v913_v36 = vmax.f32 %v667_v20, %v849_v29  ;;  %v3892_v43 = vpop.f32.mrf.mxu1  ;;  %v853_v44 = vmul.f32 0.2, %v687_v38 }
 0x17f   : > { %v839_v53 = vmul.f32 0.2, %v617_v46  ;;  %v632_v54 = vadd.f32 %v2789_v50, %v3804_v32  ;;  %2909 = vmatprep.mubr.f32.mxu1 %v901_v45  ;;  %v904_v59 = vmax.f32 %v622_v42, %v840_v49  ;;  %v912_v41 = vmax.f32 %v662_v23, %v848_v33 }
 0x180   : > { %v626_v55 = vpop.f32.mrf.mxu0  ;;  %2910 = vmatmul.mubr.f32.gmra.mxu1 %v902_v47  ;;  %v850_v42 = vmul.f32 0.2, %v672_v52  ;;  %v915_v45 = vmax.f32 %v677_v30, %v851_v37  ;;  %v852_v49 = vmul.f32 0.2, %v682_v0  ;;  %v692_v50 = vadd.f32 %v3826_v11, %v3804_v32  ;;  %v756_v22 = vpop.f32.mrf.mxu1 }
 0x181   : > { %v903_v56 = vmax.f32 %v617_v46, %v839_v53  ;;  %v627_v58 = vadd.f32 %v3804_v32, %v626_v55  ;;  %v842_v60 = vmul.f32 0.2, %v632_v54  ;;  %v697_v46 = vadd.f32 %v3804_v32, %v3838_v48  ;;  %v1480_v55 = vld [vmem:[#allocation8 + $0x8] sm:$0xff] }
 0x182   : > { %v2792_v62 = vpop.f32.mrf.mxu0  ;;  %v914_v47 = vmax.f32 %v672_v52, %v850_v42  ;;  %v917_v53 = vmax.f32 %v687_v38, %v853_v44  ;;  %v3902_v48 = vpop.f32.mrf.mxu1  ;;  %3000 = vmatprep.subr.mxu0 %v1480_v55  ;;  %v742_v23 = vadd.f32 %v3866_v63, %v3804_v32  ;;  %v752_v30 = vadd.f32 %v3880_v24, %v3804_v32 }
 0x183   : > { %v841_v1 = vmul.f32 0.2, %v627_v58  ;;  %v642_v2 = vadd.f32 %v2792_v62, %v3804_v32  ;;  %2912 = vmatprep.mubr.f32.mxu1 %v903_v56  ;;  %v906_v8 = vmax.f32 %v632_v54, %v842_v60  ;;  %v855_v54 = vmul.f32 0.2, %v697_v46  ;;  %3001 = vmatpush3.msra.mxu0 %v1480_v55  ;;  %v1479_v60 = vld [vmem:[#allocation8] sm:$0xff] }
 0x184   : > { %v636_v3 = vpop.f32.mrf.mxu0  ;;  %2913 = vmatmul.mubr.f32.gmra.mxu1 %v904_v59  ;;  %v916_v56 = vmax.f32 %v682_v0, %v852_v49  ;;  %v702_v59 = vadd.f32 %v3834_v34, %v3804_v32  ;;  %3002 = vmatprep.subr.mxu0 %v1479_v60  ;;  %v857_v62 = vmul.f32 0.2, %v707_v57  ;;  %v766_v34 = vpop.f32.mrf.mxu1  ;;  %v864_v29 = vmul.f32 0.2, %v742_v23 }
 0x185   : > { %v905_v4 = vmax.f32 %v627_v58, %v841_v1  ;;  %v637_v5 = vadd.f32 %v3804_v32, %v636_v3  ;;  %v844_v9 = vmul.f32 0.2, %v642_v2  ;;  %v854_v58 = vmul.f32 0.2, %v692_v50  ;;  %3003 = vmatpush3.msra.mxu0 %v1479_v60 }
 0x186   : > { %v2795_v10 = vpop.f32.mrf.mxu0  ;;  %v919_v11 = vmax.f32 %v697_v46, %v855_v54  ;;  %v717_v1 = vadd.f32 %v3804_v32, %v3854_v27  ;;  %v712_v3 = vadd.f32 %v3842_v61, %v3804_v32  ;;  %v2834_v27 = vpop.f32.mrf.mxu1  ;;  %v737_v61 = vadd.f32 %v3804_v32, %v3872_v12 }
 0x187   : > { %v843_v13 = vmul.f32 0.2, %v637_v5  ;;  %v652_v14 = vadd.f32 %v2795_v10, %v3804_v32  ;;  %2915 = vmatprep.mubr.f32.mxu1 %v905_v4  ;;  %v908_v21 = vmax.f32 %v642_v2, %v844_v9  ;;  %v918_v7 = vmax.f32 %v692_v50, %v854_v58 }
 0x188   : > { %v646_v15 = vpop.f32.mrf.mxu0  ;;  %2916 = vmatmul.mubr.f32.gmra.mxu1 %v906_v8  ;;  %v856_v2 = vmul.f32 0.2, %v702_v59  ;;  %v921_v4 = vmax.f32 %v707_v57, %v857_v62  ;;  %v858_v9 = vmul.f32 0.2, %v712_v3  ;;  %v722_v10 = vadd.f32 %v3850_v17, %v3804_v32  ;;  %v776_v19 = vpop.f32.mrf.mxu1 }
 0x189   : > { %v907_v16 = vmax.f32 %v637_v5, %v843_v13  ;;  %v647_v18 = vadd.f32 %v3804_v32, %v646_v15  ;;  %v846_v40 = vmul.f32 0.2, %v652_v14  ;;  %v859_v5 = vmul.f32 0.2, %v717_v1 }
 0x18a   : > { %v920_v8 = vmax.f32 %v702_v59, %v856_v2  ;;  %v922_v15 = vmax.f32 %v712_v3, %v858_v9  ;;  %v863_v20 = vmul.f32 0.2, %v737_v61  ;;  %v747_v17 = vadd.f32 %v3804_v32, %v3886_v35 }
 0x18b   : > { %v845_v25 = vmul.f32 0.2, %v647_v18  ;;  %2918 = vmatprep.mubr.f32.mxu1 %v907_v16  ;;  %v910_v31 = vmax.f32 %v652_v14, %v846_v40  ;;  %v923_v13 = vmax.f32 %v717_v1, %v859_v5  ;;  %v861_v14 = vmul.f32 0.2, %v727_v6 }
 0x18c   : > { %2919 = vmatmul.mubr.f32.gmra.mxu1 %v908_v21  ;;  %v860_v16 = vmul.f32 0.2, %v722_v10  ;;  %v927_v12 = vmax.f32 %v737_v61, %v863_v20  ;;  %v767_v35 = vadd.f32 %v3804_v32, %v766_v34  ;;  %v928_v63 = vmax.f32 %v742_v23, %v864_v29 }
 0x18d   : > { %v909_v26 = vmax.f32 %v647_v18, %v845_v25  ;;  %v732_v18 = vadd.f32 %v3858_v39, %v3804_v32  ;;  %v925_v51 = vmax.f32 %v727_v6, %v861_v14  ;;  %v2837_v25 = vpop.f32.mrf.mxu1  ;;  %v757_v39 = vadd.f32 %v3804_v32, %v756_v22  ;;  %v3939_v14 = vld [vmem:[%s4516_s4] ss:$0 sm:$0xff] }
 0x18e   : > { %v924_v21 = vmax.f32 %v722_v10, %v860_v16  ;;  %v762_v37 = vadd.f32 %v3892_v43, %v3804_v32  ;;  %v869_v42 = vmul.f32 0.2, %v767_v35  ;;  %v777_v0 = vadd.f32 %v3804_v32, %v776_v19 }
 0x18f   : > { %2921 = vmatprep.mubr.f32.mxu1 %v909_v26  ;;  %v862_v40 = vmul.f32 0.2, %v732_v18  ;;  %v865_v26 = vmul.f32 0.2, %v747_v17  ;;  %v867_v52 = vmul.f32 0.2, %v757_v39  ;;  %v772_v44 = vadd.f32 %v3902_v48, %v3804_v32 }
 0x190   : > { %2922 = vmatmul.mubr.f32.gmra.mxu1 %v910_v31  ;;  %v786_v31 = vpop.f32.mrf.mxu1  ;;  %v871_v49 = vmul.f32 0.2, %v777_v0  ;;  %v792_v48 = vadd.f32 %v2837_v25, %v3804_v32 }
 0x191   : > { %2924 = vmatprep.mubr.f32.mxu1 %v911_v28  ;;  %v926_v28 = vmax.f32 %v732_v18, %v862_v40  ;;  %v929_v33 = vmax.f32 %v747_v17, %v865_v26  ;;  %v787_v50 = vadd.f32 %v3804_v32, %v786_v31  ;;  %v870_v22 = vmul.f32 0.2, %v772_v44 }
 0x192   : > { %v2840_v38 = vpop.f32.mrf.mxu1  ;;  %v935_v57 = vmax.f32 %v777_v0, %v871_v49  ;;  %v874_v2 = vmul.f32 0.2, %v792_v48 }
 0x193   : > { %v873_v55 = vmul.f32 0.2, %v787_v50  ;;  %v934_v58 = vmax.f32 %v772_v44, %v870_v22  ;;  %v802_v3 = vadd.f32 %v2840_v38, %v3804_v32 }
 0x194   : > { %2925 = vmatmul.mubr.f32.gmra.mxu1 %v912_v41  ;;  %v931_v41 = vmax.f32 %v757_v39, %v867_v52  ;;  %v796_v46 = vpop.f32.mrf.mxu1  ;;  %v938_v5 = vmax.f32 %v792_v48, %v874_v2 }
 0x195   : > { %2927 = vmatprep.mubr.f32.mxu1 %v913_v36  ;;  %v866_v36 = vmul.f32 0.2, %v752_v30  ;;  %v876_v6 = vmul.f32 0.2, %v802_v3 }
 0x196   : > { %v2843_v54 = vpop.f32.mrf.mxu1 }
 0x197   : > { %v930_v24 = vmax.f32 %v752_v30, %v866_v36  ;;  %v940_v10 = vmax.f32 %v802_v3, %v876_v6 }
 0x198   : > { %2928 = vmatmul.mubr.f32.gmra.mxu1 %v914_v47  ;;  %v933_v47 = vmax.f32 %v767_v35, %v869_v42  ;;  %v806_v60 = vpop.f32.mrf.mxu1 }
 0x199   : > { %2930 = vmatprep.mubr.f32.mxu1 %v915_v45  ;;  %v868_v45 = vmul.f32 0.2, %v762_v37  ;;  %v807_v1 = vadd.f32 %v3804_v32, %v806_v60 }
 0x19b   : > { %v932_v43 = vmax.f32 %v762_v37, %v868_v45 }
 0x19c   : > { %2931 = vmatmul.mubr.f32.gmra.mxu1 %v916_v56  ;;  %v797_v56 = vadd.f32 %v3804_v32, %v796_v46 }
 0x19d   : > { %2933 = vmatprep.mubr.f32.mxu1 %v917_v53  ;;  %v782_v53 = vadd.f32 %v2834_v27, %v3804_v32 }
 0x19e   : > { %v875_v62 = vmul.f32 0.2, %v797_v56 }
 0x19f   : > { %v872_v59 = vmul.f32 0.2, %v782_v53 }
 0x1a0   : > { %2934 = vmatmul.mubr.f32.gmra.mxu1 %v918_v7  ;;  %v939_v34 = vmax.f32 %v797_v56, %v875_v62 }
 0x1a1   : > { %2936 = vmatprep.mubr.f32.mxu1 %v919_v11  ;;  %v937_v11 = vmax.f32 %v787_v50, %v873_v55  ;;  %v936_v7 = vmax.f32 %v782_v53, %v872_v59 }
 0x1a4   : > { %2937 = vmatmul.mubr.f32.gmra.mxu1 %v920_v8  ;;  %v812_v8 = vadd.f32 %v2843_v54, %v3804_v32 }
 0x1a5   : > { %2939 = vmatprep.mubr.f32.mxu1 %v921_v4  ;;  %v877_v4 = vmul.f32 0.2, %v807_v1 }
 0x1a6   : > { %v878_v27 = vmul.f32 0.2, %v812_v8 }
 0x1a7   : > { %v941_v9 = vmax.f32 %v807_v1, %v877_v4 }
 0x1a8   : > { %2940 = vmatmul.mubr.f32.gmra.mxu1 %v922_v15 }
 0x1a9   : > { %2942 = vmatprep.mubr.f32.mxu1 %v923_v13  ;;  %v942_v13 = vmax.f32 %v812_v8, %v878_v27 }
 0x1ac   : > { %2943 = vmatmul.mubr.f32.gmra.mxu1 %v924_v21 }
 0x1ad   : > { %2945 = vmatprep.mubr.f32.mxu1 %v925_v51 }
 0x1b0   : > { %2946 = vmatmul.mubr.f32.gmra.mxu1 %v926_v28 }
 0x1b1   : > { %2948 = vmatprep.mubr.f32.mxu1 %v927_v12 }
 0x1b4   : > { %2949 = vmatmul.mubr.f32.gmra.mxu1 %v928_v63 }
 0x1b5   : > { %2951 = vmatprep.mubr.f32.mxu1 %v929_v33 }
 0x1b8   : > { %2952 = vmatmul.mubr.f32.gmra.mxu1 %v930_v24 }
 0x1b9   : > { %2954 = vmatprep.mubr.f32.mxu1 %v931_v41 }
 0x1bc   : > { %2955 = vmatmul.mubr.f32.gmra.mxu1 %v932_v43 }
 0x1bd   : > { %2957 = vmatprep.mubr.f32.mxu1 %v933_v47 }
 0x1c0   : > { %2958 = vmatmul.mubr.f32.gmra.mxu1 %v934_v58 }
 0x1c1   : > { %2960 = vmatprep.mubr.f32.mxu1 %v935_v57 }
 0x1c4   : > { %2961 = vmatmul.mubr.f32.gmra.mxu1 %v936_v7 }
 0x1c5   : > { %2963 = vmatprep.mubr.f32.mxu1 %v937_v11 }
 0x1c8   : > { %2964 = vmatmul.mubr.f32.gmra.mxu1 %v938_v5 }
 0x1c9   : > { %2966 = vmatprep.mubr.f32.mxu1 %v939_v34 }
 0x1cc   : > { %2967 = vmatmul.mubr.f32.gmra.mxu1 %v940_v10 }
 0x1cd   : > { %2969 = vmatprep.mubr.f32.mxu1 %v941_v9 }
 0x1d0   : > { %2970 = vmatmul.mubr.f32.gmra.mxu1 %v942_v13 }
 0x214   : > { %v2878_v61 = vpop.f32.mrf.mxu1 }
 0x215   : > { %v1038_v15 = vadd.f32 %v2878_v61, %v3939_v14 }
 0x216   : > { %v1032_v16 = vpop.f32.mrf.mxu1 }
 0x217   : > { %v1033_v32 = vadd.f32 %v3939_v14, %v1032_v16  ;;  %v1352_v18 = vmul.f32 0.2, %v1038_v15 }
 0x218   : > { %v2881_v19 = vpop.f32.mrf.mxu1 }
 0x219   : > { %v1351_v51 = vmul.f32 0.2, %v1033_v32  ;;  %v1048_v20 = vadd.f32 %v2881_v19, %v3939_v14  ;;  %v1416_v23 = vmax.f32 %v1038_v15, %v1352_v18 }
 0x21a   : > { %v1042_v17 = vpop.f32.mrf.mxu1 }
 0x21b   : > { %v1415_v21 = vmax.f32 %v1033_v32, %v1351_v51  ;;  %v1043_v40 = vadd.f32 %v3939_v14, %v1042_v17  ;;  %v1354_v25 = vmul.f32 0.2, %v1048_v20 }
 0x21c   : > { %v2884_v12 = vpop.f32.mrf.mxu1 }
 0x21d   : > { %v1353_v26 = vmul.f32 0.2, %v1043_v40  ;;  %v1058_v39 = vadd.f32 %v2884_v12, %v3939_v14  ;;  %3004 = vmatprep.mubr.f32.mxu0 %v1415_v21  ;;  %v1418_v31 = vmax.f32 %v1048_v20, %v1354_v25 }
 0x21e   : > { %v1052_v28 = vpop.f32.mrf.mxu1  ;;  %3005 = vmatmul.mubr.f32.vlgmr.msra.gmra.mxu0 %v1416_v23 }
 0x21f   : > { %v1417_v29 = vmax.f32 %v1043_v40, %v1353_v26  ;;  %v1053_v30 = vadd.f32 %v3939_v14, %v1052_v28  ;;  %v1356_v33 = vmul.f32 0.2, %v1058_v39 }
 0x220   : > { %v2887_v52 = vpop.f32.mrf.mxu1 }
 0x221   : > { %v1355_v35 = vmul.f32 0.2, %v1053_v30  ;;  %v1068_v63 = vadd.f32 %v2887_v52, %v3939_v14  ;;  %3007 = vmatprep.mubr.f32.mxu0 %v1417_v29  ;;  %v1420_v41 = vmax.f32 %v1058_v39, %v1356_v33 }
 0x222   : > { %v1062_v36 = vpop.f32.mrf.mxu1  ;;  %3008 = vmatmul.mubr.f32.gmra.mxu0 %v1418_v31 }
 0x223   : > { %v1419_v37 = vmax.f32 %v1053_v30, %v1355_v35  ;;  %v1063_v38 = vadd.f32 %v3939_v14, %v1062_v36  ;;  %v1358_v42 = vmul.f32 0.2, %v1068_v63 }
 0x224   : > { %v2890_v0 = vpop.f32.mrf.mxu1 }
 0x225   : > { %v1357_v24 = vmul.f32 0.2, %v1063_v38  ;;  %v1078_v45 = vadd.f32 %v2890_v0, %v3939_v14  ;;  %3010 = vmatprep.mubr.f32.mxu0 %v1419_v37  ;;  %v1422_v49 = vmax.f32 %v1068_v63, %v1358_v42 }
 0x226   : > { %v1072_v44 = vpop.f32.mrf.mxu1  ;;  %3011 = vmatmul.mubr.f32.gmra.mxu0 %v1420_v41 }
 0x227   : > { %v1421_v46 = vmax.f32 %v1063_v38, %v1357_v24  ;;  %v1073_v47 = vadd.f32 %v3939_v14, %v1072_v44  ;;  %v1360_v50 = vmul.f32 0.2, %v1078_v45 }
 0x228   : > { %v2893_v43 = vpop.f32.mrf.mxu1 }
 0x229   : > { %v1359_v22 = vmul.f32 0.2, %v1073_v47  ;;  %v1088_v53 = vadd.f32 %v2893_v43, %v3939_v14  ;;  %3013 = vmatprep.mubr.f32.mxu0 %v1421_v46  ;;  %v1424_v56 = vmax.f32 %v1078_v45, %v1360_v50 }
 0x22a   : > { %v1082_v54 = vpop.f32.mrf.mxu1  ;;  %3014 = vmatmul.mubr.f32.gmra.mxu0 %v1422_v49 }
 0x22b   : > { %v1423_v57 = vmax.f32 %v1073_v47, %v1359_v22  ;;  %v1083_v55 = vadd.f32 %v3939_v14, %v1082_v54  ;;  %v1362_v58 = vmul.f32 0.2, %v1088_v53 }
 0x22c   : > { %v2896_v59 = vpop.f32.mrf.mxu1 }
 0x22d   : > { %v1361_v48 = vmul.f32 0.2, %v1083_v55  ;;  %v1098_v60 = vadd.f32 %v2896_v59, %v3939_v14  ;;  %3016 = vmatprep.mubr.f32.mxu0 %v1423_v57  ;;  %v1426_v7 = vmax.f32 %v1088_v53, %v1362_v58 }
 0x22e   : > { %v1092_v11 = vpop.f32.mrf.mxu1  ;;  %3017 = vmatmul.mubr.f32.gmra.mxu0 %v1424_v56 }
 0x22f   : > { %v1425_v62 = vmax.f32 %v1083_v55, %v1361_v48  ;;  %v1093_v1 = vadd.f32 %v3939_v14, %v1092_v11  ;;  %v1364_v2 = vmul.f32 0.2, %v1098_v60 }
 0x230   : > { %v2899_v3 = vpop.f32.mrf.mxu1 }
 0x231   : > { %v1363_v34 = vmul.f32 0.2, %v1093_v1  ;;  %v1108_v4 = vadd.f32 %v2899_v3, %v3939_v14  ;;  %3019 = vmatprep.mubr.f32.mxu0 %v1425_v62  ;;  %v1428_v9 = vmax.f32 %v1098_v60, %v1364_v2 }
 0x232   : > { %v1102_v5 = vpop.f32.mrf.mxu1  ;;  %3020 = vmatmul.mubr.f32.gmra.mxu0 %v1426_v7 }
 0x233   : > { %v1427_v6 = vmax.f32 %v1093_v1, %v1363_v34  ;;  %v1103_v8 = vadd.f32 %v3939_v14, %v1102_v5  ;;  %v1366_v10 = vmul.f32 0.2, %v1108_v4 }
 0x234   : > { %v2902_v27 = vpop.f32.mrf.mxu1 }
 0x235   : > { %v1365_v13 = vmul.f32 0.2, %v1103_v8  ;;  %v1118_v61 = vadd.f32 %v2902_v27, %v3939_v14  ;;  %3022 = vmatprep.mubr.f32.mxu0 %v1427_v6  ;;  %v1430_v18 = vmax.f32 %v1108_v4, %v1366_v10 }
 0x236   : > { %v1112_v15 = vpop.f32.mrf.mxu1  ;;  %3023 = vmatmul.mubr.f32.gmra.mxu0 %v1428_v9 }
 0x237   : > { %v1429_v16 = vmax.f32 %v1103_v8, %v1365_v13  ;;  %v1113_v32 = vadd.f32 %v3939_v14, %v1112_v15  ;;  %v1368_v19 = vmul.f32 0.2, %v1118_v61 }
 0x238   : > { %v2905_v51 = vpop.f32.mrf.mxu1 }
 0x239   : > { %v1367_v20 = vmul.f32 0.2, %v1113_v32  ;;  %v1128_v17 = vadd.f32 %v2905_v51, %v3939_v14  ;;  %3025 = vmatprep.mubr.f32.mxu0 %v1429_v16  ;;  %v1432_v25 = vmax.f32 %v1118_v61, %v1368_v19 }
 0x23a   : > { %v1122_v21 = vpop.f32.mrf.mxu1  ;;  %3026 = vmatmul.mubr.f32.gmra.mxu0 %v1430_v18 }
 0x23b   : > { %v1431_v40 = vmax.f32 %v1113_v32, %v1367_v20  ;;  %v1123_v23 = vadd.f32 %v3939_v14, %v1122_v21  ;;  %v1370_v12 = vmul.f32 0.2, %v1128_v17 }
 0x23c   : > { %v2908_v26 = vpop.f32.mrf.mxu1 }
 0x23d   : > { %v1369_v39 = vmul.f32 0.2, %v1123_v23  ;;  %v1138_v28 = vadd.f32 %v2908_v26, %v3939_v14  ;;  %3028 = vmatprep.mubr.f32.mxu0 %v1431_v40  ;;  %v1434_v33 = vmax.f32 %v1128_v17, %v1370_v12 }
 0x23e   : > { %v1132_v29 = vpop.f32.mrf.mxu1  ;;  %3029 = vmatmul.mubr.f32.gmra.mxu0 %v1432_v25 }
 0x23f   : > { %v1433_v30 = vmax.f32 %v1123_v23, %v1369_v39  ;;  %v1133_v31 = vadd.f32 %v3939_v14, %v1132_v29  ;;  %v1372_v52 = vmul.f32 0.2, %v1138_v28 }
 0x240   : > { %v2911_v35 = vpop.f32.mrf.mxu1 }
 0x241   : > { %v1371_v63 = vmul.f32 0.2, %v1133_v31  ;;  %v1148_v36 = vadd.f32 %v2911_v35, %v3939_v14  ;;  %3031 = vmatprep.mubr.f32.mxu0 %v1433_v30  ;;  %v1436_v42 = vmax.f32 %v1138_v28, %v1372_v52 }
 0x242   : > { %v1142_v37 = vpop.f32.mrf.mxu1  ;;  %3032 = vmatmul.mubr.f32.gmra.mxu0 %v1434_v33 }
 0x243   : > { %v1435_v38 = vmax.f32 %v1133_v31, %v1371_v63  ;;  %v1143_v41 = vadd.f32 %v3939_v14, %v1142_v37  ;;  %v1374_v0 = vmul.f32 0.2, %v1148_v36 }
 0x244   : > { %v2914_v24 = vpop.f32.mrf.mxu1 }
 0x245   : > { %v1373_v45 = vmul.f32 0.2, %v1143_v41  ;;  %v1158_v44 = vadd.f32 %v2914_v24, %v3939_v14  ;;  %3034 = vmatprep.mubr.f32.mxu0 %v1435_v38  ;;  %v1438_v50 = vmax.f32 %v1148_v36, %v1374_v0 }
 0x246   : > { %v1152_v46 = vpop.f32.mrf.mxu1  ;;  %3035 = vmatmul.mubr.f32.gmra.mxu0 %v1436_v42 }
 0x247   : > { %v1437_v47 = vmax.f32 %v1143_v41, %v1373_v45  ;;  %v1153_v49 = vadd.f32 %v3939_v14, %v1152_v46  ;;  %v1376_v43 = vmul.f32 0.2, %v1158_v44 }
 0x248   : > { %v2917_v22 = vpop.f32.mrf.mxu1 }
 0x249   : > { %v1375_v53 = vmul.f32 0.2, %v1153_v49  ;;  %v1168_v54 = vadd.f32 %v2917_v22, %v3939_v14  ;;  %3037 = vmatprep.mubr.f32.mxu0 %v1437_v47  ;;  %v1440_v58 = vmax.f32 %v1158_v44, %v1376_v43 }
 0x24a   : > { %v1162_v57 = vpop.f32.mrf.mxu1  ;;  %3038 = vmatmul.mubr.f32.gmra.mxu0 %v1438_v50 }
 0x24b   : > { %v1439_v55 = vmax.f32 %v1153_v49, %v1375_v53  ;;  %v1163_v56 = vadd.f32 %v3939_v14, %v1162_v57  ;;  %v1378_v59 = vmul.f32 0.2, %v1168_v54 }
 0x24c   : > { %v2920_v48 = vpop.f32.mrf.mxu1 }
 0x24d   : > { %v1377_v60 = vmul.f32 0.2, %v1163_v56  ;;  %v1178_v11 = vadd.f32 %v2920_v48, %v3939_v14  ;;  %3040 = vmatprep.mubr.f32.mxu0 %v1439_v55  ;;  %v1442_v2 = vmax.f32 %v1168_v54, %v1378_v59 }
 0x24e   : > { %v1172_v62 = vpop.f32.mrf.mxu1  ;;  %3041 = vmatmul.mubr.f32.gmra.mxu0 %v1440_v58 }
 0x24f   : > { %v1441_v1 = vmax.f32 %v1163_v56, %v1377_v60  ;;  %v1173_v7 = vadd.f32 %v3939_v14, %v1172_v62  ;;  %v1380_v3 = vmul.f32 0.2, %v1178_v11 }
 0x250   : > { %v2923_v34 = vpop.f32.mrf.mxu1 }
 0x251   : > { %v1379_v4 = vmul.f32 0.2, %v1173_v7  ;;  %v1188_v5 = vadd.f32 %v2923_v34, %v3939_v14  ;;  %3043 = vmatprep.mubr.f32.mxu0 %v1441_v1  ;;  %v1444_v10 = vmax.f32 %v1178_v11, %v1380_v3 }
 0x252   : > { %v1182_v6 = vpop.f32.mrf.mxu1  ;;  %3044 = vmatmul.mubr.f32.gmra.mxu0 %v1442_v2 }
 0x253   : > { %v1443_v8 = vmax.f32 %v1173_v7, %v1379_v4  ;;  %v1183_v9 = vadd.f32 %v3939_v14, %v1182_v6  ;;  %v1382_v27 = vmul.f32 0.2, %v1188_v5 }
 0x254   : > { %v2926_v13 = vpop.f32.mrf.mxu1 }
 0x255   : > { %v1381_v61 = vmul.f32 0.2, %v1183_v9  ;;  %v1198_v15 = vadd.f32 %v2926_v13, %v3939_v14  ;;  %3046 = vmatprep.mubr.f32.mxu0 %v1443_v8  ;;  %v1446_v19 = vmax.f32 %v1188_v5, %v1382_v27 }
 0x256   : > { %v1192_v16 = vpop.f32.mrf.mxu1  ;;  %3047 = vmatmul.mubr.f32.gmra.mxu0 %v1444_v10 }
 0x257   : > { %v1445_v32 = vmax.f32 %v1183_v9, %v1381_v61  ;;  %v1193_v18 = vadd.f32 %v3939_v14, %v1192_v16  ;;  %v1384_v51 = vmul.f32 0.2, %v1198_v15 }
 0x258   : > { %v2929_v20 = vpop.f32.mrf.mxu1 }
 0x259   : > { %v1383_v17 = vmul.f32 0.2, %v1193_v18  ;;  %v1208_v21 = vadd.f32 %v2929_v20, %v3939_v14  ;;  %3049 = vmatprep.mubr.f32.mxu0 %v1445_v32  ;;  %v1448_v12 = vmax.f32 %v1198_v15, %v1384_v51 }
 0x25a   : > { %v1202_v40 = vpop.f32.mrf.mxu1  ;;  %3050 = vmatmul.mubr.f32.gmra.mxu0 %v1446_v19 }
 0x25b   : > { %v1447_v23 = vmax.f32 %v1193_v18, %v1383_v17  ;;  %v1203_v25 = vadd.f32 %v3939_v14, %v1202_v40  ;;  %v1386_v26 = vmul.f32 0.2, %v1208_v21 }
 0x25c   : > { %v2932_v39 = vpop.f32.mrf.mxu1 }
 0x25d   : > { %v1385_v28 = vmul.f32 0.2, %v1203_v25  ;;  %v1218_v29 = vadd.f32 %v2932_v39, %v3939_v14  ;;  %3052 = vmatprep.mubr.f32.mxu0 %v1447_v23  ;;  %v1450_v52 = vmax.f32 %v1208_v21, %v1386_v26 }
 0x25e   : > { %v1212_v30 = vpop.f32.mrf.mxu1  ;;  %3053 = vmatmul.mubr.f32.gmra.mxu0 %v1448_v12 }
 0x25f   : > { %v1449_v31 = vmax.f32 %v1203_v25, %v1385_v28  ;;  %v1213_v33 = vadd.f32 %v3939_v14, %v1212_v30  ;;  %v1388_v35 = vmul.f32 0.2, %v1218_v29 }
 0x260   : > { %v2935_v63 = vpop.f32.mrf.mxu1 }
 0x261   : > { %v1387_v36 = vmul.f32 0.2, %v1213_v33  ;;  %v1228_v37 = vadd.f32 %v2935_v63, %v3939_v14  ;;  %3055 = vmatprep.mubr.f32.mxu0 %v1449_v31  ;;  %v1452_v0 = vmax.f32 %v1218_v29, %v1388_v35 }
 0x262   : > { %v1222_v38 = vpop.f32.mrf.mxu1  ;;  %3056 = vmatmul.mubr.f32.gmra.mxu0 %v1450_v52 }
 0x263   : > { %v1451_v41 = vmax.f32 %v1213_v33, %v1387_v36  ;;  %v1223_v42 = vadd.f32 %v3939_v14, %v1222_v38  ;;  %v1390_v24 = vmul.f32 0.2, %v1228_v37 }
 0x264   : > { %v2938_v45 = vpop.f32.mrf.mxu1 }
 0x265   : > { %v1389_v44 = vmul.f32 0.2, %v1223_v42  ;;  %v1238_v46 = vadd.f32 %v2938_v45, %v3939_v14  ;;  %3058 = vmatprep.mubr.f32.mxu0 %v1451_v41  ;;  %v1454_v43 = vmax.f32 %v1228_v37, %v1390_v24 }
 0x266   : > { %v1232_v47 = vpop.f32.mrf.mxu1  ;;  %3059 = vmatmul.mubr.f32.gmra.mxu0 %v1452_v0 }
 0x267   : > { %v1453_v49 = vmax.f32 %v1223_v42, %v1389_v44  ;;  %v1233_v50 = vadd.f32 %v3939_v14, %v1232_v47  ;;  %v1392_v22 = vmul.f32 0.2, %v1238_v46 }
 0x268   : > { %v2941_v53 = vpop.f32.mrf.mxu1 }
 0x269   : > { %v1391_v54 = vmul.f32 0.2, %v1233_v50  ;;  %v1248_v57 = vadd.f32 %v2941_v53, %v3939_v14  ;;  %3061 = vmatprep.mubr.f32.mxu0 %v1453_v49  ;;  %v1456_v59 = vmax.f32 %v1238_v46, %v1392_v22 }
 0x26a   : > { %v1242_v55 = vpop.f32.mrf.mxu1  ;;  %3062 = vmatmul.mubr.f32.gmra.mxu0 %v1454_v43 }
 0x26b   : > { %v1455_v56 = vmax.f32 %v1233_v50, %v1391_v54  ;;  %v1243_v58 = vadd.f32 %v3939_v14, %v1242_v55  ;;  %v1394_v48 = vmul.f32 0.2, %v1248_v57 }
 0x26c   : > { %v2944_v60 = vpop.f32.mrf.mxu1 }
 0x26d   : > { %v1393_v11 = vmul.f32 0.2, %v1243_v58  ;;  %v1258_v62 = vadd.f32 %v2944_v60, %v3939_v14  ;;  %3064 = vmatprep.mubr.f32.mxu0 %v1455_v56  ;;  %v1458_v3 = vmax.f32 %v1248_v57, %v1394_v48 }
 0x26e   : > { %v1252_v1 = vpop.f32.mrf.mxu1  ;;  %3065 = vmatmul.mubr.f32.gmra.mxu0 %v1456_v59 }
 0x26f   : > { %v1457_v7 = vmax.f32 %v1243_v58, %v1393_v11  ;;  %v1253_v2 = vadd.f32 %v3939_v14, %v1252_v1  ;;  %v1396_v34 = vmul.f32 0.2, %v1258_v62 }
 0x270   : > { %v2947_v4 = vpop.f32.mrf.mxu1 }
 0x271   : > { %v1395_v5 = vmul.f32 0.2, %v1253_v2  ;;  %v1268_v6 = vadd.f32 %v2947_v4, %v3939_v14  ;;  %3067 = vmatprep.mubr.f32.mxu0 %v1457_v7  ;;  %v1460_v27 = vmax.f32 %v1258_v62, %v1396_v34 }
 0x272   : > { %v1262_v8 = vpop.f32.mrf.mxu1  ;;  %3068 = vmatmul.mubr.f32.gmra.mxu0 %v1458_v3 }
 0x273   : > { %v1459_v9 = vmax.f32 %v1253_v2, %v1395_v5  ;;  %v1263_v10 = vadd.f32 %v3939_v14, %v1262_v8  ;;  %v1398_v13 = vmul.f32 0.2, %v1268_v6 }
 0x274   : > { %v2950_v61 = vpop.f32.mrf.mxu1 }
 0x275   : > { %v1397_v15 = vmul.f32 0.2, %v1263_v10  ;;  %v1278_v16 = vadd.f32 %v2950_v61, %v3939_v14  ;;  %3070 = vmatprep.mubr.f32.mxu0 %v1459_v9  ;;  %v1462_v51 = vmax.f32 %v1268_v6, %v1398_v13 }
 0x276   : > { %v1272_v32 = vpop.f32.mrf.mxu1  ;;  %3071 = vmatmul.mubr.f32.gmra.mxu0 %v1460_v27 }
 0x277   : > { %v1461_v18 = vmax.f32 %v1263_v10, %v1397_v15  ;;  %v1273_v19 = vadd.f32 %v3939_v14, %v1272_v32  ;;  %v1400_v20 = vmul.f32 0.2, %v1278_v16 }
 0x278   : > { %v2953_v17 = vpop.f32.mrf.mxu1 }
 0x279   : > { %v1399_v21 = vmul.f32 0.2, %v1273_v19  ;;  %v1288_v40 = vadd.f32 %v2953_v17, %v3939_v14  ;;  %3073 = vmatprep.mubr.f32.mxu0 %v1461_v18  ;;  %v1464_v26 = vmax.f32 %v1278_v16, %v1400_v20  ;;  %v4008_v18 = vld [vmem:[%s4518_s6] ss:$0 sm:$0xff] }
 0x27a   : > { %v1282_v23 = vpop.f32.mrf.mxu1  ;;  %3074 = vmatmul.mubr.f32.gmra.mxu0 %v1462_v51 }
 0x27b   : > { %v1463_v25 = vmax.f32 %v1273_v19, %v1399_v21  ;;  %v1283_v12 = vadd.f32 %v3939_v14, %v1282_v23  ;;  %v1402_v39 = vmul.f32 0.2, %v1288_v40 }
 0x27c   : > { %v2956_v28 = vpop.f32.mrf.mxu1 }
 0x27d   : > { %v1401_v29 = vmul.f32 0.2, %v1283_v12  ;;  %v1298_v30 = vadd.f32 %v2956_v28, %v3939_v14  ;;  %3076 = vmatprep.mubr.f32.mxu0 %v1463_v25  ;;  %v1466_v35 = vmax.f32 %v1288_v40, %v1402_v39 }
 0x27e   : > { %v1292_v31 = vpop.f32.mrf.mxu1  ;;  %3077 = vmatmul.mubr.f32.gmra.mxu0 %v1464_v26 }
 0x27f   : > { %v1465_v33 = vmax.f32 %v1283_v12, %v1401_v29  ;;  %v1293_v52 = vadd.f32 %v3939_v14, %v1292_v31  ;;  %v1404_v63 = vmul.f32 0.2, %v1298_v30 }
 0x280   : > { %v2959_v36 = vpop.f32.mrf.mxu1 }
 0x281   : > { %v1403_v37 = vmul.f32 0.2, %v1293_v52  ;;  %v1308_v38 = vadd.f32 %v2959_v36, %v3939_v14  ;;  %3079 = vmatprep.mubr.f32.mxu0 %v1465_v33  ;;  %v1468_v24 = vmax.f32 %v1298_v30, %v1404_v63 }
 0x282   : > { %v1302_v41 = vpop.f32.mrf.mxu1  ;;  %3080 = vmatmul.mubr.f32.gmra.mxu0 %v1466_v35 }
 0x283   : > { %v1467_v42 = vmax.f32 %v1293_v52, %v1403_v37  ;;  %v1303_v0 = vadd.f32 %v3939_v14, %v1302_v41  ;;  %v1406_v45 = vmul.f32 0.2, %v1308_v38 }
 0x284   : > { %v2962_v44 = vpop.f32.mrf.mxu1 }
 0x285   : > { %v1405_v46 = vmul.f32 0.2, %v1303_v0  ;;  %v1318_v47 = vadd.f32 %v2962_v44, %v3939_v14  ;;  %3082 = vmatprep.mubr.f32.mxu0 %v1467_v42  ;;  %v1470_v22 = vmax.f32 %v1308_v38, %v1406_v45 }
 0x286   : > { %v1312_v49 = vpop.f32.mrf.mxu1  ;;  %3083 = vmatmul.mubr.f32.gmra.mxu0 %v1468_v24 }
 0x287   : > { %v1469_v50 = vmax.f32 %v1303_v0, %v1405_v46  ;;  %v1313_v43 = vadd.f32 %v3939_v14, %v1312_v49  ;;  %v1408_v53 = vmul.f32 0.2, %v1318_v47 }
 0x288   : > { %v2965_v54 = vpop.f32.mrf.mxu1 }
 0x289   : > { %v1407_v57 = vmul.f32 0.2, %v1313_v43  ;;  %v1328_v55 = vadd.f32 %v2965_v54, %v3939_v14  ;;  %3085 = vmatprep.mubr.f32.mxu0 %v1469_v50  ;;  %v1472_v48 = vmax.f32 %v1318_v47, %v1408_v53 }
 0x28a   : > { %v1322_v56 = vpop.f32.mrf.mxu1  ;;  %3086 = vmatmul.mubr.f32.gmra.mxu0 %v1470_v22 }
 0x28b   : > { %v1471_v58 = vmax.f32 %v1313_v43, %v1407_v57  ;;  %v1323_v59 = vadd.f32 %v3939_v14, %v1322_v56  ;;  %v1410_v60 = vmul.f32 0.2, %v1328_v55 }
 0x28c   : > { %v2968_v11 = vpop.f32.mrf.mxu1 }
 0x28d   : > { %v1409_v62 = vmul.f32 0.2, %v1323_v59  ;;  %v1338_v1 = vadd.f32 %v2968_v11, %v3939_v14  ;;  %3088 = vmatprep.mubr.f32.mxu0 %v1471_v58  ;;  %v1474_v34 = vmax.f32 %v1328_v55, %v1410_v60 }
 0x28e   : > { %v1332_v7 = vpop.f32.mrf.mxu1  ;;  %3089 = vmatmul.mubr.f32.gmra.mxu0 %v1472_v48 }
 0x28f   : > { %v1473_v2 = vmax.f32 %v1323_v59, %v1409_v62  ;;  %v1333_v3 = vadd.f32 %v3939_v14, %v1332_v7  ;;  %v1412_v4 = vmul.f32 0.2, %v1338_v1 }
 0x290   : > { %v2971_v5 = vpop.f32.mrf.mxu1 }
 0x291   : > { %v1411_v6 = vmul.f32 0.2, %v1333_v3  ;;  %v1348_v8 = vadd.f32 %v2971_v5, %v3939_v14  ;;  %3091 = vmatprep.mubr.f32.mxu0 %v1473_v2  ;;  %v1476_v13 = vmax.f32 %v1338_v1, %v1412_v4 }
 0x292   : > { %v1342_v9 = vpop.f32.mrf.mxu1  ;;  %3092 = vmatmul.mubr.f32.gmra.mxu0 %v1474_v34 }
 0x293   : > { %v1475_v10 = vmax.f32 %v1333_v3, %v1411_v6  ;;  %v1343_v27 = vadd.f32 %v3939_v14, %v1342_v9  ;;  %v1414_v61 = vmul.f32 0.2, %v1348_v8 }
 0x295   : > { %v1413_v15 = vmul.f32 0.2, %v1343_v27  ;;  %3094 = vmatprep.mubr.f32.mxu0 %v1475_v10  ;;  %v1478_v32 = vmax.f32 %v1348_v8, %v1414_v61 }
 0x296   : > { %3095 = vmatmul.mubr.f32.gmra.mxu0 %v1476_v13 }
 0x297   : > { %v1477_v16 = vmax.f32 %v1343_v27, %v1413_v15 }
 0x299   : > { %3097 = vmatprep.mubr.f32.mxu0 %v1477_v16 }
 0x29a   : > { %3098 = vmatmul.mubr.f32.gmra.mxu0 %v1478_v32 }
 0x2de   : > { %v3006_v19 = vpop.f32.mrf.mxu0 }
 0x2df   : > { %v4011_v51 = vadd.f32 %v3006_v19, %v4008_v18 }
 0x2e0   : > { %v1568_v20 = vpop.f32.mrf.mxu0 }
 0x2e1   : > { %v4014_v14 = vadd.f32 %v4008_v18, %v1568_v20  ;;  %v1888_v17 = vmul.f32 %v4011_v51, %v4011_v51 }
 0x2e2   : > { %v3009_v21 = vpop.f32.mrf.mxu0 }
 0x2e3   : > { %v4019_v40 = vadd.f32 %v3009_v21, %v4008_v18  ;;  %1953 = vadd.xlane.f32.xlu0 %v1888_v17  ;;  %v1887_v26 = vmul.f32 %v4014_v14, %v4014_v14 }
 0x2e4   : > { %v1578_v23 = vpop.f32.mrf.mxu0 }
 0x2e5   : > { %v4022_v25 = vadd.f32 %v4008_v18, %v1578_v23  ;;  %v1890_v12 = vmul.f32 %v4019_v40, %v4019_v40 }
 0x2e6   : > { %v3012_v39 = vpop.f32.mrf.mxu0 }
 0x2e7   : > { %1957 = vadd.xlane.f32.xlu1 %v1890_v12  ;;  %1951 = vadd.xlane.f32.xlu0 %v1887_v26  ;;  %v4029_v29 = vadd.f32 %v3012_v39, %v4008_v18  ;;  %v1889_v31 = vmul.f32 %v4022_v25, %v4022_v25 }
 0x2e8   : > { %v1588_v28 = vpop.f32.mrf.mxu0 }
 0x2e9   : > { %v4032_v30 = vadd.f32 %v4008_v18, %v1588_v28  ;;  %v1892_v37 = vmul.f32 %v4029_v29, %v4029_v29 }
 0x2ea   : > { %v3015_v33 = vpop.f32.mrf.mxu0 }
 0x2eb   : > { %1955 = vadd.xlane.f32.xlu1 %v1889_v31  ;;  %v1891_v52 = vmul.f32 %v4032_v30, %v4032_v30  ;;  %v4039_v63 = vadd.f32 %v3015_v33, %v4008_v18 }
 0x2ec   : > { %v1598_v35 = vpop.f32.mrf.mxu0 }
 0x2ed   : > { %v4042_v36 = vadd.f32 %v4008_v18, %v1598_v35  ;;  %1959 = vadd.xlane.f32.xlu0 %v1891_v52  ;;  %v1894_v45 = vmul.f32 %v4039_v63, %v4039_v63 }
 0x2ee   : > { %v3018_v38 = vpop.f32.mrf.mxu0 }
 0x2ef   : > { %1961 = vadd.xlane.f32.xlu1 %v1892_v37  ;;  %v1893_v41 = vmul.f32 %v4042_v36, %v4042_v36  ;;  %v4049_v0 = vadd.f32 %v3018_v38, %v4008_v18 }
 0x2f0   : > { %v1608_v42 = vpop.f32.mrf.mxu0 }
 0x2f1   : > { %v4052_v24 = vadd.f32 %v4008_v18, %v1608_v42  ;;  %1963 = vadd.xlane.f32.xlu0 %v1893_v41  ;;  %v1896_v43 = vmul.f32 %v4049_v0, %v4049_v0 }
 0x2f2   : > { %v3021_v44 = vpop.f32.mrf.mxu0 }
 0x2f3   : > { %1965 = vadd.xlane.f32.xlu1 %v1894_v45  ;;  %v1895_v46 = vmul.f32 %v4052_v24, %v4052_v24  ;;  %v4059_v49 = vadd.f32 %v3021_v44, %v4008_v18 }
 0x2f4   : > { %v1618_v47 = vpop.f32.mrf.mxu0 }
 0x2f5   : > { %v4062_v50 = vadd.f32 %v4008_v18, %v1618_v47  ;;  %1967 = vadd.xlane.f32.xlu0 %v1895_v46  ;;  %v1898_v56 = vmul.f32 %v4059_v49, %v4059_v49 }
 0x2f6   : > { %v3024_v22 = vpop.f32.mrf.mxu0 }
 0x2f7   : > { %1969 = vadd.xlane.f32.xlu1 %v1896_v43  ;;  %v1897_v53 = vmul.f32 %v4062_v50, %v4062_v50  ;;  %v4069_v57 = vadd.f32 %v3024_v22, %v4008_v18 }
 0x2f8   : > { %v1628_v54 = vpop.f32.mrf.mxu0 }
 0x2f9   : > { %v4072_v55 = vadd.f32 %v4008_v18, %v1628_v54  ;;  %1971 = vadd.xlane.f32.xlu0 %v1897_v53  ;;  %v1900_v62 = vmul.f32 %v4069_v57, %v4069_v57 }
 0x2fa   : > { %v3027_v58 = vpop.f32.mrf.mxu0 }
 0x2fb   : > { %1973 = vadd.xlane.f32.xlu1 %v1898_v56  ;;  %v1899_v59 = vmul.f32 %v4072_v55, %v4072_v55  ;;  %v4079_v60 = vadd.f32 %v3027_v58, %v4008_v18 }
 0x2fc   : > { %v1638_v48 = vpop.f32.mrf.mxu0 }
 0x2fd   : > { %v4082_v11 = vadd.f32 %v4008_v18, %v1638_v48  ;;  %1975 = vadd.xlane.f32.xlu0 %v1899_v59  ;;  %v1902_v4 = vmul.f32 %v4079_v60, %v4079_v60 }
 0x2fe   : > { %v3030_v1 = vpop.f32.mrf.mxu0 }
 0x2ff   : > { %1977 = vadd.xlane.f32.xlu1 %v1900_v62  ;;  %v1901_v7 = vmul.f32 %v4082_v11, %v4082_v11  ;;  %v4089_v3 = vadd.f32 %v3030_v1, %v4008_v18 }
 0x300   : > { %v1648_v2 = vpop.f32.mrf.mxu0 }
 0x301   : > { %v4092_v34 = vadd.f32 %v4008_v18, %v1648_v2  ;;  %1979 = vadd.xlane.f32.xlu0 %v1901_v7  ;;  %v1904_v27 = vmul.f32 %v4089_v3, %v4089_v3 }
 0x302   : > { %v3033_v5 = vpop.f32.mrf.mxu0 }
 0x303   : > { %1981 = vadd.xlane.f32.xlu1 %v1902_v4  ;;  %v1903_v6 = vmul.f32 %v4092_v34, %v4092_v34  ;;  %v4099_v9 = vadd.f32 %v3033_v5, %v4008_v18 }
 0x304   : > { %v1658_v8 = vpop.f32.mrf.mxu0 }
 0x305   : > { %v4102_v10 = vadd.f32 %v4008_v18, %v1658_v8  ;;  %1983 = vadd.xlane.f32.xlu0 %v1903_v6  ;;  %v1906_v19 = vmul.f32 %v4099_v9, %v4099_v9 }
 0x306   : > { %v3036_v13 = vpop.f32.mrf.mxu0 }
 0x307   : > { %1985 = vadd.xlane.f32.xlu1 %v1904_v27  ;;  %v1905_v61 = vmul.f32 %v4102_v10, %v4102_v10  ;;  %v4109_v16 = vadd.f32 %v3036_v13, %v4008_v18 }
 0x308   : > { %v1668_v15 = vpop.f32.mrf.mxu0 }
 0x309   : > { %v4112_v32 = vadd.f32 %v4008_v18, %v1668_v15  ;;  %1987 = vadd.xlane.f32.xlu0 %v1905_v61  ;;  %v1908_v26 = vmul.f32 %v4109_v16, %v4109_v16 }
 0x30a   : > { %v3039_v20 = vpop.f32.mrf.mxu0 }
 0x30b   : > { %1989 = vadd.xlane.f32.xlu1 %v1906_v19  ;;  %v1907_v17 = vmul.f32 %v4112_v32, %v4112_v32  ;;  %v4119_v23 = vadd.f32 %v3039_v20, %v4008_v18 }
 0x30c   : > { %v1678_v21 = vpop.f32.mrf.mxu0 }
 0x30d   : > { %v4122_v12 = vadd.f32 %v4008_v18, %v1678_v21  ;;  %1991 = vadd.xlane.f32.xlu0 %v1907_v17  ;;  %v1910_v35 = vmul.f32 %v4119_v23, %v4119_v23 }
 0x30e   : > { %v3042_v39 = vpop.f32.mrf.mxu0 }
 0x30f   : > { %1993 = vadd.xlane.f32.xlu1 %v1908_v26  ;;  %v1909_v28 = vmul.f32 %v4122_v12, %v4122_v12  ;;  %v4129_v33 = vadd.f32 %v3042_v39, %v4008_v18 }
 0x310   : > { %v1688_v31 = vpop.f32.mrf.mxu0 }
 0x311   : > { %v4132_v52 = vadd.f32 %v4008_v18, %v1688_v31  ;;  %1995 = vadd.xlane.f32.xlu0 %v1909_v28  ;;  %v1912_v44 = vmul.f32 %v4129_v33, %v4129_v33 }
 0x312   : > { %v3045_v37 = vpop.f32.mrf.mxu0 }
 0x313   : > { %1997 = vadd.xlane.f32.xlu1 %v1910_v35  ;;  %v1911_v38 = vmul.f32 %v4132_v52, %v4132_v52  ;;  %v4139_v42 = vadd.f32 %v3045_v37, %v4008_v18 }
 0x314   : > { %v1698_v41 = vpop.f32.mrf.mxu0 }
 0x315   : > { %v4142_v45 = vadd.f32 %v4008_v18, %v1698_v41  ;;  %1999 = vadd.xlane.f32.xlu0 %v1911_v38  ;;  %v1914_v54 = vmul.f32 %v4139_v42, %v4139_v42 }
 0x316   : > { %v3048_v46 = vpop.f32.mrf.mxu0 }
 0x317   : > { %2001 = vadd.xlane.f32.xlu1 %v1912_v44  ;;  %v1913_v47 = vmul.f32 %v4142_v45, %v4142_v45  ;;  %v4149_v22 = vadd.f32 %v3048_v46, %v4008_v18 }
 0x318   : > { %v1708_v43 = vpop.f32.mrf.mxu0 }
 0x319   : > { %v4152_v53 = vadd.f32 %v4008_v18, %v1708_v43  ;;  %2003 = vadd.xlane.f32.xlu0 %v1913_v47  ;;  %v1916_v1 = vmul.f32 %v4149_v22, %v4149_v22 }
 0x31a   : > { %v3051_v56 = vpop.f32.mrf.mxu0 }
 0x31b   : > { %2005 = vadd.xlane.f32.xlu1 %v1914_v54  ;;  %v1915_v58 = vmul.f32 %v4152_v53, %v4152_v53  ;;  %v4159_v48 = vadd.f32 %v3051_v56, %v4008_v18 }
 0x31c   : > { %v1718_v59 = vpop.f32.mrf.mxu0 }
 0x31d   : > { %v4162_v62 = vadd.f32 %v4008_v18, %v1718_v59  ;;  %2007 = vadd.xlane.f32.xlu0 %v1915_v58  ;;  %v1918_v8 = vmul.f32 %v4159_v48, %v4159_v48 }
 0x31e   : > { %v3054_v7 = vpop.f32.mrf.mxu0 }
 0x31f   : > { %2009 = vadd.xlane.f32.xlu1 %v1916_v1  ;;  %v1917_v2 = vmul.f32 %v4162_v62, %v4162_v62  ;;  %v4169_v5 = vadd.f32 %v3054_v7, %v4008_v18 }
 0x320   : > { %v1728_v4 = vpop.f32.mrf.mxu0 }
 0x321   : > { %v4172_v6 = vadd.f32 %v4008_v18, %v1728_v4  ;;  %2011 = vadd.xlane.f32.xlu0 %v1917_v2  ;;  %v1920_v20 = vmul.f32 %v4169_v5, %v4169_v5 }
 0x322   : > { %v3057_v27 = vpop.f32.mrf.mxu0 }
 0x323   : > { %2013 = vadd.xlane.f32.xlu1 %v1918_v8  ;;  %v1919_v13 = vmul.f32 %v4172_v6, %v4172_v6  ;;  %v4179_v15 = vadd.f32 %v3057_v27, %v4008_v18 }
 0x324   : > { %v1738_v61 = vpop.f32.mrf.mxu0 }
 0x325   : > { %v4182_v19 = vadd.f32 %v4008_v18, %v1738_v61  ;;  %2015 = vadd.xlane.f32.xlu0 %v1919_v13  ;;  %v1922_v31 = vmul.f32 %v4179_v15, %v4179_v15 }
 0x326   : > { %v3060_v17 = vpop.f32.mrf.mxu0 }
 0x327   : > { %2017 = vadd.xlane.f32.xlu1 %v1920_v20  ;;  %v1921_v21 = vmul.f32 %v4182_v19, %v4182_v19  ;;  %v4189_v39 = vadd.f32 %v3060_v17, %v4008_v18 }
 0x328   : > { %v1748_v26 = vpop.f32.mrf.mxu0 }
 0x329   : > { %v4192_v28 = vadd.f32 %v4008_v18, %v1748_v26  ;;  %2019 = vadd.xlane.f32.xlu0 %v1921_v21  ;;  %v1924_v46 = vmul.f32 %v4189_v39, %v4189_v39 }
 0x32a   : > { %v3063_v35 = vpop.f32.mrf.mxu0 }
 0x32b   : > { %2021 = vadd.xlane.f32.xlu1 %v1922_v31  ;;  %v1923_v37 = vmul.f32 %v4192_v28, %v4192_v28  ;;  %v4199_v41 = vadd.f32 %v3063_v35, %v4008_v18 }
 0x32c   : > { %v1758_v38 = vpop.f32.mrf.mxu0 }
 0x32d   : > { %v4202_v44 = vadd.f32 %v4008_v18, %v1758_v38  ;;  %2023 = vadd.xlane.f32.xlu0 %v1923_v37  ;;  %v1926_v59 = vmul.f32 %v4199_v41, %v4199_v41 }
 0x32e   : > { %v3066_v47 = vpop.f32.mrf.mxu0 }
 0x32f   : > { %2025 = vadd.xlane.f32.xlu1 %v1924_v46  ;;  %v1925_v43 = vmul.f32 %v4202_v44, %v4202_v44  ;;  %v4209_v56 = vadd.f32 %v3066_v47, %v4008_v18 }
 0x330   : > { %v1768_v54 = vpop.f32.mrf.mxu0 }
 0x331   : > { %v4212_v58 = vadd.f32 %v4008_v18, %v1768_v54  ;;  %2027 = vadd.xlane.f32.xlu0 %v1925_v43  ;;  %v1928_v27 = vmul.f32 %v4209_v56, %v4209_v56 }
 0x332   : > { %v3069_v1 = vpop.f32.mrf.mxu0 }
 0x333   : > { %2029 = vadd.xlane.f32.xlu1 %v1926_v59  ;;  %v1927_v7 = vmul.f32 %v4212_v58, %v4212_v58  ;;  %v4219_v4 = vadd.f32 %v3069_v1, %v4008_v18 }
 0x334   : > { %v1778_v2 = vpop.f32.mrf.mxu0 }
 0x335   : > { %v4222_v8 = vadd.f32 %v4008_v18, %v1778_v2  ;;  %2031 = vadd.xlane.f32.xlu0 %v1927_v7  ;;  %v1930_v26 = vmul.f32 %v4219_v4, %v4219_v4 }
 0x336   : > { %v3072_v13 = vpop.f32.mrf.mxu0 }
 0x337   : > { %2033 = vadd.xlane.f32.xlu1 %v1928_v27  ;;  %v1929_v61 = vmul.f32 %v4222_v8, %v4222_v8  ;;  %v4229_v17 = vadd.f32 %v3072_v13, %v4008_v18 }
 0x338   : > { %v1788_v20 = vpop.f32.mrf.mxu0 }
 0x339   : > { %v4232_v21 = vadd.f32 %v4008_v18, %v1788_v20  ;;  %2035 = vadd.xlane.f32.xlu0 %v1929_v61  ;;  %v1932_v47 = vmul.f32 %v4229_v17, %v4229_v17 }
 0x33a   : > { %v3075_v31 = vpop.f32.mrf.mxu0 }
 0x33b   : > { %2037 = vadd.xlane.f32.xlu1 %v1930_v26  ;;  %v1931_v35 = vmul.f32 %v4232_v21, %v4232_v21  ;;  %v4239_v38 = vadd.f32 %v3075_v31, %v4008_v18 }
 0x33c   : > { %v1798_v37 = vpop.f32.mrf.mxu0 }
 0x33d   : > { %v4242_v46 = vadd.f32 %v4008_v18, %v1798_v37  ;;  %2039 = vadd.xlane.f32.xlu0 %v1931_v35  ;;  %v1934_v2 = vmul.f32 %v4239_v38, %v4239_v38 }
 0x33e   : > { %v3078_v43 = vpop.f32.mrf.mxu0 }
 0x33f   : > { %2041 = vadd.xlane.f32.xlu1 %v1932_v47  ;;  %v1933_v54 = vmul.f32 %v4242_v46, %v4242_v46  ;;  %v4249_v1 = vadd.f32 %v3078_v43, %v4008_v18 }
 0x340   : > { %v1808_v59 = vpop.f32.mrf.mxu0 }
 0x341   : > { %4557 = vst [vmem:[#allocation15_spill] sm:$0xff] %v4249_v1  ;;  %v4252_v7 = vadd.f32 %v4008_v18, %v1808_v59  ;;  %2043 = vadd.xlane.f32.xlu0 %v1933_v54  ;;  %v1936_v31 = vmul.f32 %v4249_v1, %v4249_v1 }
 0x342   : > { %v3081_v27 = vpop.f32.mrf.mxu0 }
 0x343   : > { %2045 = vadd.xlane.f32.xlu1 %v1934_v2  ;;  %v1935_v13 = vmul.f32 %v4252_v7, %v4252_v7  ;;  %v4259_v20 = vadd.f32 %v3081_v27, %v4008_v18 }
 0x344   : > { %v1818_v61 = vpop.f32.mrf.mxu0 }
 0x345   : > { %4558 = vst [vmem:[#allocation16_spill] sm:$0xff] %v4259_v20  ;;  %v4262_v26 = vadd.f32 %v4008_v18, %v1818_v61  ;;  %2047 = vadd.xlane.f32.xlu0 %v1935_v13  ;;  %v1938_v59 = vmul.f32 %v4259_v20, %v4259_v20 }
 0x346   : > { %v3084_v35 = vpop.f32.mrf.mxu0 }
 0x347   : > { %4559 = vst [vmem:[#allocation17_spill] sm:$0xff] %v4262_v26  ;;  %2049 = vadd.xlane.f32.xlu1 %v1936_v31  ;;  %v1937_v37 = vmul.f32 %v4262_v26, %v4262_v26  ;;  %v4269_v43 = vadd.f32 %v3084_v35, %v4008_v18 }
 0x348   : > { %v1828_v47 = vpop.f32.mrf.mxu0 }
 0x349   : > { %4560 = vst [vmem:[#allocation18_spill] sm:$0xff] %v4269_v43  ;;  %v4272_v54 = vadd.f32 %v4008_v18, %v1828_v47  ;;  %2051 = vadd.xlane.f32.xlu0 %v1937_v37  ;;  %v1940_v35 = vmul.f32 %v4269_v43, %v4269_v43 }
 0x34a   : > { %v3087_v2 = vpop.f32.mrf.mxu0 }
 0x34b   : > { %4561 = vst [vmem:[#allocation19_spill] sm:$0xff] %v4272_v54  ;;  %2053 = vadd.xlane.f32.xlu1 %v1938_v59  ;;  %v1939_v27 = vmul.f32 %v4272_v54, %v4272_v54  ;;  %v4279_v61 = vadd.f32 %v3087_v2, %v4008_v18 }
 0x34c   : > { %v1838_v13 = vpop.f32.mrf.mxu0 }
 0x34d   : > { %4562 = vst [vmem:[#allocation20_spill] sm:$0xff] %v4279_v61  ;;  %v4282_v31 = vadd.f32 %v4008_v18, %v1838_v13  ;;  %2055 = vadd.xlane.f32.xlu0 %v1939_v27  ;;  %v1942_v2 = vmul.f32 %v4279_v61, %v4279_v61 }
 0x34e   : > { %v3090_v37 = vpop.f32.mrf.mxu0 }
 0x34f   : > { %4563 = vst [vmem:[#allocation21_spill] sm:$0xff] %v4282_v31  ;;  %2057 = vadd.xlane.f32.xlu1 %v1940_v35  ;;  %v1941_v47 = vmul.f32 %v4282_v31, %v4282_v31  ;;  %v4289_v20 = vadd.f32 %v3090_v37, %v4008_v18 }
 0x350   : > { %v1848_v59 = vpop.f32.mrf.mxu0 }
 0x351   : > { %4564 = vst [vmem:[#allocation22_spill] sm:$0xff] %v4289_v20  ;;  %v4292_v54 = vadd.f32 %v4008_v18, %v1848_v59  ;;  %2059 = vadd.xlane.f32.xlu0 %v1941_v47  ;;  %v1944_v37 = vmul.f32 %v4289_v20, %v4289_v20 }
 0x352   : > { %v3093_v27 = vpop.f32.mrf.mxu0 }
 0x353   : > { %4565 = vst [vmem:[#allocation23_spill] sm:$0xff] %v4292_v54  ;;  %2061 = vadd.xlane.f32.xlu1 %v1942_v2  ;;  %v1943_v13 = vmul.f32 %v4292_v54, %v4292_v54  ;;  %v4299_v43 = vadd.f32 %v3093_v27, %v4008_v18 }
 0x354   : > { %v1858_v35 = vpop.f32.mrf.mxu0 }
 0x355   : > { %4566 = vst [vmem:[#allocation24_spill] sm:$0xff] %v4299_v43  ;;  %v4302_v31 = vadd.f32 %v4008_v18, %v1858_v35  ;;  %2063 = vadd.xlane.f32.xlu0 %v1943_v13  ;;  %v1946_v27 = vmul.f32 %v4299_v43, %v4299_v43 }
 0x356   : > { %v3096_v47 = vpop.f32.mrf.mxu0 }
 0x357   : > { %4567 = vst [vmem:[#allocation25_spill] sm:$0xff] %v4302_v31  ;;  %2065 = vadd.xlane.f32.xlu1 %v1944_v37  ;;  %v1945_v59 = vmul.f32 %v4302_v31, %v4302_v31  ;;  %v4309_v61 = vadd.f32 %v3096_v47, %v4008_v18 }
 0x358   : > { %v1868_v2 = vpop.f32.mrf.mxu0 }
 0x359   : > { %4568 = vst [vmem:[#allocation26_spill] sm:$0xff] %v4309_v61  ;;  %v4312_v54 = vadd.f32 %v4008_v18, %v1868_v2  ;;  %2067 = vadd.xlane.f32.xlu0 %v1945_v59  ;;  %v1948_v47 = vmul.f32 %v4309_v61, %v4309_v61 }
 0x35a   : > { %v3099_v13 = vpop.f32.mrf.mxu0 }
 0x35b   : > { %4569 = vst [vmem:[#allocation27_spill] sm:$0xff] %v4312_v54  ;;  %2069 = vadd.xlane.f32.xlu1 %v1946_v27  ;;  %v1947_v35 = vmul.f32 %v4312_v54, %v4312_v54  ;;  %v4319_v20 = vadd.f32 %v3099_v13, %v4008_v18 }
 0x35c   : > { %v1878_v37 = vpop.f32.mrf.mxu0 }
 0x35d   : > { %4570 = vst [vmem:[#allocation28_spill] sm:$0xff] %v4319_v20  ;;  %v4322_v31 = vadd.f32 %v4008_v18, %v1878_v37  ;;  %2071 = vadd.xlane.f32.xlu0 %v1947_v35  ;;  %v1950_v2 = vmul.f32 %v4319_v20, %v4319_v20 }
 0x35f   : > { %4571 = vst [vmem:[#allocation29_spill] sm:$0xff] %v4322_v31  ;;  %2073 = vadd.xlane.f32.xlu1 %v1948_v47  ;;  %v1949_v59 = vmul.f32 %v4322_v31, %v4322_v31 }
 0x361   : > { %2075 = vadd.xlane.f32.xlu0 %v1949_v59 }
 0x363   : > { %2077 = vadd.xlane.f32.xlu1 %v1950_v2 }
 0x36c   : > { %v1954_v27 = vpop.xlane.xlu0 %1953 }
 0x36d   : > { %v2080_v54 = vmax.f32 %v1954_v27, 1e-24 }
 0x36f   : > { %3213 = vrsqrt.f32 %v2080_v54 }
 0x370   : > { %v1958_v13 = vpop.xlane.xlu1 %1957  ;;  %v1952_v43 = vpop.xlane.xlu0 %1951 }
 0x371   : > { %v2082_v18 = vmax.f32 %v1958_v13, 1e-24  ;;  %v2079_v37 = vmax.f32 %v1952_v43, 1e-24 }
 0x373   : > { %3215 = vrsqrt.f32 %v2082_v18 }
 0x374   : > { %3217 = vrsqrt.f32 %v2079_v37  ;;  %v1956_v35 = vpop.xlane.xlu1 %1955 }
 0x375   : > { %v2081_v61 = vmax.f32 %v1956_v35, 1e-24 }
 0x376   : > { %v1960_v47 = vpop.xlane.xlu0 %1959 }
 0x377   : > { %3219 = vrsqrt.f32 %v2081_v61  ;;  %v2083_v31 = vmax.f32 %v1960_v47, 1e-24 }
 0x378   : > { %v1962_v59 = vpop.xlane.xlu1 %1961 }
 0x379   : > { %3221 = vrsqrt.f32 %v2083_v31  ;;  %v2084_v26 = vmax.f32 %v1962_v59, 1e-24 }
 0x37a   : > { %v1964_v20 = vpop.xlane.xlu0 %1963 }
 0x37b   : > { %3223 = vrsqrt.f32 %v2084_v26  ;;  %v2085_v2 = vmax.f32 %v1964_v20, 1e-24 }
 0x37c   : > { %v3214_v27 = vpop.eup %3213  ;;  %v1966_v54 = vpop.xlane.xlu1 %1965 }
 0x37d   : > { %v2208_v1 = vmul.f32 %v3214_v27, %v4011_v51  ;;  %3225 = vrsqrt.f32 %v2085_v2  ;;  %v2086_v43 = vmax.f32 %v1966_v54, 1e-24 }
 0x37e   : > { %v1968_v13 = vpop.xlane.xlu0 %1967 }
 0x37f   : > { %2272 = vst [vmem:[%s4333_s11 + $0x8] sm:$0xff] %v2208_v1  ;;  %3227 = vrsqrt.f32 %v2086_v43  ;;  %v2087_v61 = vmax.f32 %v1968_v13, 1e-24 }
 0x380   : > { %v3216_v31 = vpop.eup %3215  ;;  %v1970_v18 = vpop.xlane.xlu1 %1969 }
 0x381   : > { %v3218_v26 = vpop.eup %3217  ;;  %v2210_v20 = vmul.f32 %v3216_v31, %v4019_v40  ;;  %3229 = vrsqrt.f32 %v2087_v61  ;;  %v2088_v51 = vmax.f32 %v1970_v18, 1e-24 }
 0x382   : > { %v2207_v37 = vmul.f32 %v3218_v26, %v4014_v14  ;;  %v1972_v35 = vpop.xlane.xlu0 %1971 }
 0x383   : > { %2274 = vst [vmem:[%s4333_s11 + $0x18] sm:$0xff] %v2210_v20  ;;  %3231 = vrsqrt.f32 %v2088_v51  ;;  %v2089_v47 = vmax.f32 %v1972_v35, 1e-24 }
 0x384   : > { %v3220_v59 = vpop.eup %3219  ;;  %2271 = vst [vmem:[%s4333_s11] sm:$0xff] %v2207_v37  ;;  %v1974_v1 = vpop.xlane.xlu1 %1973 }
 0x385   : > { %v2209_v2 = vmul.f32 %v3220_v59, %v4022_v25  ;;  %3233 = vrsqrt.f32 %v2089_v47  ;;  %v2090_v27 = vmax.f32 %v1974_v1, 1e-24 }
 0x386   : > { %v3222_v54 = vpop.eup %3221  ;;  %v1976_v40 = vpop.xlane.xlu0 %1975 }
 0x387   : > { %2273 = vst [vmem:[%s4333_s11 + $0x10] sm:$0xff] %v2209_v2  ;;  %v2211_v43 = vmul.f32 %v3222_v54, %v4032_v30  ;;  %3235 = vrsqrt.f32 %v2090_v27  ;;  %v2091_v14 = vmax.f32 %v1976_v40, 1e-24 }
 0x388   : > { %v3224_v13 = vpop.eup %3223  ;;  %v1978_v61 = vpop.xlane.xlu1 %1977 }
 0x389   : > { %2275 = vst [vmem:[%s4333_s11 + $0x20] sm:$0xff] %v2211_v43  ;;  %v2212_v31 = vmul.f32 %v3224_v13, %v4029_v29  ;;  %3237 = vrsqrt.f32 %v2091_v14  ;;  %v2092_v18 = vmax.f32 %v1978_v61, 1e-24 }
 0x38a   : > { %v3226_v25 = vpop.eup %3225  ;;  %v1980_v26 = vpop.xlane.xlu0 %1979 }
 0x38b   : > { %2276 = vst [vmem:[%s4333_s11 + $0x28] sm:$0xff] %v2212_v31  ;;  %v2213_v20 = vmul.f32 %v3226_v25, %v4042_v36  ;;  %3239 = vrsqrt.f32 %v2092_v18  ;;  %v2093_v51 = vmax.f32 %v1980_v26, 1e-24 }
 0x38c   : > { %v3228_v30 = vpop.eup %3227  ;;  %v1982_v37 = vpop.xlane.xlu1 %1981 }
 0x38d   : > { %2277 = vst [vmem:[%s4333_s11 + $0x30] sm:$0xff] %v2213_v20  ;;  %v2214_v35 = vmul.f32 %v3228_v30, %v4039_v63  ;;  %3241 = vrsqrt.f32 %v2093_v51  ;;  %v2094_v47 = vmax.f32 %v1982_v37, 1e-24 }
 0x38e   : > { %v3230_v29 = vpop.eup %3229  ;;  %v1984_v59 = vpop.xlane.xlu0 %1983 }
 0x38f   : > { %2278 = vst [vmem:[%s4333_s11 + $0x38] sm:$0xff] %v2214_v35  ;;  %v2215_v1 = vmul.f32 %v3230_v29, %v4052_v24  ;;  %3243 = vrsqrt.f32 %v2094_v47  ;;  %v2095_v2 = vmax.f32 %v1984_v59, 1e-24 }
 0x390   : > { %v3232_v36 = vpop.eup %3231  ;;  %v1986_v27 = vpop.xlane.xlu1 %1985 }
 0x391   : > { %2279 = vst [vmem:[%s4333_s11 + $0x40] sm:$0xff] %v2215_v1  ;;  %v2216_v54 = vmul.f32 %v3232_v36, %v4049_v0  ;;  %3245 = vrsqrt.f32 %v2095_v2  ;;  %v2096_v40 = vmax.f32 %v1986_v27, 1e-24 }
 0x392   : > { %v3234_v63 = vpop.eup %3233  ;;  %v1988_v43 = vpop.xlane.xlu0 %1987 }
 0x393   : > { %2280 = vst [vmem:[%s4333_s11 + $0x48] sm:$0xff] %v2216_v54  ;;  %v2217_v14 = vmul.f32 %v3234_v63, %v4062_v50  ;;  %3247 = vrsqrt.f32 %v2096_v40  ;;  %v2097_v13 = vmax.f32 %v1988_v43, 1e-24 }
 0x394   : > { %v3236_v24 = vpop.eup %3235  ;;  %v1990_v61 = vpop.xlane.xlu1 %1989 }
 0x395   : > { %2281 = vst [vmem:[%s4333_s11 + $0x50] sm:$0xff] %v2217_v14  ;;  %v2218_v31 = vmul.f32 %v3236_v24, %v4059_v49  ;;  %3249 = vrsqrt.f32 %v2097_v13  ;;  %v2098_v18 = vmax.f32 %v1990_v61, 1e-24 }
 0x396   : > { %v3238_v0 = vpop.eup %3237  ;;  %v1992_v25 = vpop.xlane.xlu0 %1991 }
 0x397   : > { %2282 = vst [vmem:[%s4333_s11 + $0x58] sm:$0xff] %v2218_v31  ;;  %v2219_v26 = vmul.f32 %v3238_v0, %v4072_v55  ;;  %3251 = vrsqrt.f32 %v2098_v18  ;;  %v2099_v20 = vmax.f32 %v1992_v25, 1e-24 }
 0x398   : > { %v3240_v50 = vpop.eup %3239  ;;  %v1994_v51 = vpop.xlane.xlu1 %1993 }
 0x399   : > { %2283 = vst [vmem:[%s4333_s11 + $0x60] sm:$0xff] %v2219_v26  ;;  %v2220_v30 = vmul.f32 %v3240_v50, %v4069_v57  ;;  %3253 = vrsqrt.f32 %v2099_v20  ;;  %v2100_v37 = vmax.f32 %v1994_v51, 1e-24 }
 0x39a   : > { %v3242_v49 = vpop.eup %3241  ;;  %v1996_v35 = vpop.xlane.xlu0 %1995 }
 0x39b   : > { %2284 = vst [vmem:[%s4333_s11 + $0x68] sm:$0xff] %v2220_v30  ;;  %v2221_v47 = vmul.f32 %v3242_v49, %v4082_v11  ;;  %3255 = vrsqrt.f32 %v2100_v37  ;;  %v2101_v29 = vmax.f32 %v1996_v35, 1e-24 }
 0x39c   : > { %v3244_v55 = vpop.eup %3243  ;;  %v1998_v59 = vpop.xlane.xlu1 %1997 }
 0x39d   : > { %2285 = vst [vmem:[%s4333_s11 + $0x70] sm:$0xff] %v2221_v47  ;;  %v2222_v1 = vmul.f32 %v3244_v55, %v4079_v60  ;;  %3257 = vrsqrt.f32 %v2101_v29  ;;  %v2102_v2 = vmax.f32 %v1998_v59, 1e-24 }
 0x39e   : > { %v3246_v57 = vpop.eup %3245  ;;  %v2000_v36 = vpop.xlane.xlu0 %1999 }
 0x39f   : > { %2286 = vst [vmem:[%s4333_s11 + $0x78] sm:$0xff] %v2222_v1  ;;  %v2223_v27 = vmul.f32 %v3246_v57, %v4092_v34  ;;  %3259 = vrsqrt.f32 %v2102_v2  ;;  %v2103_v54 = vmax.f32 %v2000_v36, 1e-24 }
 0x3a0   : > { %v3248_v11 = vpop.eup %3247  ;;  %v2002_v40 = vpop.xlane.xlu1 %2001 }
 0x3a1   : > { %2287 = vst [vmem:[%s4333_s11 + $0x80] sm:$0xff] %v2223_v27  ;;  %v2224_v63 = vmul.f32 %v3248_v11, %v4089_v3  ;;  %3261 = vrsqrt.f32 %v2103_v54  ;;  %v2104_v43 = vmax.f32 %v2002_v40, 1e-24 }
 0x3a2   : > { %v3250_v60 = vpop.eup %3249  ;;  %v2004_v14 = vpop.xlane.xlu0 %2003 }
 0x3a3   : > { %2288 = vst [vmem:[%s4333_s11 + $0x88] sm:$0xff] %v2224_v63  ;;  %v2225_v13 = vmul.f32 %v3250_v60, %v4102_v10  ;;  %3263 = vrsqrt.f32 %v2104_v43  ;;  %v2105_v24 = vmax.f32 %v2004_v14, 1e-24 }
 0x3a4   : > { %v3252_v34 = vpop.eup %3251  ;;  %v2006_v61 = vpop.xlane.xlu1 %2005 }
 0x3a5   : > { %2289 = vst [vmem:[%s4333_s11 + $0x90] sm:$0xff] %v2225_v13  ;;  %v2226_v31 = vmul.f32 %v3252_v34, %v4099_v9  ;;  %3265 = vrsqrt.f32 %v2105_v24  ;;  %v2106_v18 = vmax.f32 %v2006_v61, 1e-24 }
 0x3a6   : > { %v3254_v3 = vpop.eup %3253  ;;  %v2008_v0 = vpop.xlane.xlu0 %2007 }
 0x3a7   : > { %2290 = vst [vmem:[%s4333_s11 + $0x98] sm:$0xff] %v2226_v31  ;;  %v2227_v25 = vmul.f32 %v3254_v3, %v4112_v32  ;;  %3267 = vrsqrt.f32 %v2106_v18  ;;  %v2107_v26 = vmax.f32 %v2008_v0, 1e-24 }
 0x3a8   : > { %v3256_v10 = vpop.eup %3255  ;;  %v2010_v20 = vpop.xlane.xlu1 %2009 }
 0x3a9   : > { %2291 = vst [vmem:[%s4333_s11 + $0xa0] sm:$0xff] %v2227_v25  ;;  %v2228_v50 = vmul.f32 %v3256_v10, %v4109_v16  ;;  %3269 = vrsqrt.f32 %v2107_v26  ;;  %v2108_v51 = vmax.f32 %v2010_v20, 1e-24 }
 0x3aa   : > { %v3258_v9 = vpop.eup %3257  ;;  %v2012_v30 = vpop.xlane.xlu0 %2011 }
 0x3ab   : > { %2292 = vst [vmem:[%s4333_s11 + $0xa8] sm:$0xff] %v2228_v50  ;;  %v2229_v37 = vmul.f32 %v3258_v9, %v4122_v12  ;;  %3271 = vrsqrt.f32 %v2108_v51  ;;  %v2109_v49 = vmax.f32 %v2012_v30, 1e-24 }
 0x3ac   : > { %v3260_v32 = vpop.eup %3259  ;;  %v2014_v35 = vpop.xlane.xlu1 %2013 }
 0x3ad   : > { %2293 = vst [vmem:[%s4333_s11 + $0xb0] sm:$0xff] %v2229_v37  ;;  %v2230_v47 = vmul.f32 %v3260_v32, %v4119_v23  ;;  %3273 = vrsqrt.f32 %v2109_v49  ;;  %v2110_v29 = vmax.f32 %v2014_v35, 1e-24 }
 0x3ae   : > { %v3262_v16 = vpop.eup %3261  ;;  %v2016_v55 = vpop.xlane.xlu0 %2015 }
 0x3af   : > { %2294 = vst [vmem:[%s4333_s11 + $0xb8] sm:$0xff] %v2230_v47  ;;  %v2231_v59 = vmul.f32 %v3262_v16, %v4132_v52  ;;  %3275 = vrsqrt.f32 %v2110_v29  ;;  %v2111_v1 = vmax.f32 %v2016_v55, 1e-24 }
 0x3b0   : > { %v3264_v12 = vpop.eup %3263  ;;  %v2018_v2 = vpop.xlane.xlu1 %2017 }
 0x3b1   : > { %2295 = vst [vmem:[%s4333_s11 + $0xc0] sm:$0xff] %v2231_v59  ;;  %v2232_v57 = vmul.f32 %v3264_v12, %v4129_v33  ;;  %3277 = vrsqrt.f32 %v2111_v1  ;;  %v2112_v36 = vmax.f32 %v2018_v2, 1e-24 }
 0x3b2   : > { %v3266_v23 = vpop.eup %3265  ;;  %v2020_v27 = vpop.xlane.xlu0 %2019 }
 0x3b3   : > { %2296 = vst [vmem:[%s4333_s11 + $0xc8] sm:$0xff] %v2232_v57  ;;  %v2233_v54 = vmul.f32 %v3266_v23, %v4142_v45  ;;  %3279 = vrsqrt.f32 %v2112_v36  ;;  %v2113_v11 = vmax.f32 %v2020_v27, 1e-24 }
 0x3b4   : > { %v3268_v52 = vpop.eup %3267  ;;  %v2022_v40 = vpop.xlane.xlu1 %2021 }
 0x3b5   : > { %2297 = vst [vmem:[%s4333_s11 + $0xd0] sm:$0xff] %v2233_v54  ;;  %v2234_v63 = vmul.f32 %v3268_v52, %v4139_v42  ;;  %3281 = vrsqrt.f32 %v2113_v11  ;;  %v2114_v43 = vmax.f32 %v2022_v40, 1e-24 }
 0x3b6   : > { %v3270_v33 = vpop.eup %3269  ;;  %v2024_v60 = vpop.xlane.xlu0 %2023 }
 0x3b7   : > { %2298 = vst [vmem:[%s4333_s11 + $0xd8] sm:$0xff] %v2234_v63  ;;  %v2235_v14 = vmul.f32 %v3270_v33, %v4152_v53  ;;  %3283 = vrsqrt.f32 %v2114_v43  ;;  %v2115_v13 = vmax.f32 %v2024_v60, 1e-24 }
 0x3b8   : > { %v3272_v45 = vpop.eup %3271  ;;  %v2026_v24 = vpop.xlane.xlu1 %2025 }
 0x3b9   : > { %2299 = vst [vmem:[%s4333_s11 + $0xe0] sm:$0xff] %v2235_v14  ;;  %v2236_v34 = vmul.f32 %v3272_v45, %v4149_v22  ;;  %3285 = vrsqrt.f32 %v2115_v13  ;;  %v2116_v61 = vmax.f32 %v2026_v24, 1e-24 }
 0x3ba   : > { %v3274_v42 = vpop.eup %3273  ;;  %v2028_v31 = vpop.xlane.xlu0 %2027 }
 0x3bb   : > { %2300 = vst [vmem:[%s4333_s11 + $0xe8] sm:$0xff] %v2236_v34  ;;  %v2237_v18 = vmul.f32 %v3274_v42, %v4162_v62  ;;  %3287 = vrsqrt.f32 %v2116_v61  ;;  %v2117_v3 = vmax.f32 %v2028_v31, 1e-24 }
 0x3bc   : > { %v3276_v53 = vpop.eup %3275  ;;  %v2030_v0 = vpop.xlane.xlu1 %2029 }
 0x3bd   : > { %2301 = vst [vmem:[%s4333_s11 + $0xf0] sm:$0xff] %v2237_v18  ;;  %v2238_v25 = vmul.f32 %v3276_v53, %v4159_v48  ;;  %3289 = vrsqrt.f32 %v2117_v3  ;;  %v2118_v26 = vmax.f32 %v2030_v0, 1e-24 }
 0x3be   : > { %v3278_v22 = vpop.eup %3277  ;;  %v2032_v10 = vpop.xlane.xlu0 %2031 }
 0x3bf   : > { %2302 = vst [vmem:[%s4333_s11 + $0xf8] sm:$0xff] %v2238_v25  ;;  %v2239_v20 = vmul.f32 %v3278_v22, %v4172_v6  ;;  %3291 = vrsqrt.f32 %v2118_v26  ;;  %v2119_v50 = vmax.f32 %v2032_v10, 1e-24 }
 0x3c0   : > { %v3280_v62 = vpop.eup %3279  ;;  %v2034_v51 = vpop.xlane.xlu1 %2033 }
 0x3c1   : > { %2303 = vst [vmem:[%s4333_s11 + $0x100] sm:$0xff] %v2239_v20  ;;  %v2240_v9 = vmul.f32 %v3280_v62, %v4169_v5  ;;  %3293 = vrsqrt.f32 %v2119_v50  ;;  %v2120_v30 = vmax.f32 %v2034_v51, 1e-24 }
 0x3c2   : > { %v3282_v48 = vpop.eup %3281  ;;  %v2036_v37 = vpop.xlane.xlu0 %2035 }
 0x3c3   : > { %2304 = vst [vmem:[%s4333_s11 + $0x108] sm:$0xff] %v2240_v9  ;;  %v2241_v49 = vmul.f32 %v3282_v48, %v4182_v19  ;;  %3295 = vrsqrt.f32 %v2120_v30  ;;  %v2121_v32 = vmax.f32 %v2036_v37, 1e-24  ;;  %v4572_v48 = vld [vmem:[#allocation15_spill] sm:$0xff] }
 0x3c4   : > { %v3284_v6 = vpop.eup %3283  ;;  %v2038_v35 = vpop.xlane.xlu1 %2037 }
 0x3c5   : > { %2305 = vst [vmem:[%s4333_s11 + $0x110] sm:$0xff] %v2241_v49  ;;  %v2242_v47 = vmul.f32 %v3284_v6, %v4179_v15  ;;  %3297 = vrsqrt.f32 %v2121_v32  ;;  %v2122_v29 = vmax.f32 %v2038_v35, 1e-24  ;;  %v4573_v6 = vld [vmem:[#allocation17_spill] sm:$0xff] }
 0x3c6   : > { %v3286_v5 = vpop.eup %3285  ;;  %v2040_v16 = vpop.xlane.xlu0 %2039 }
 0x3c7   : > { %2306 = vst [vmem:[%s4333_s11 + $0x118] sm:$0xff] %v2242_v47  ;;  %v2243_v55 = vmul.f32 %v3286_v5, %v4192_v28  ;;  %3299 = vrsqrt.f32 %v2122_v29  ;;  %v2123_v59 = vmax.f32 %v2040_v16, 1e-24  ;;  %v4574_v5 = vld [vmem:[#allocation16_spill] sm:$0xff] }
 0x3c8   : > { %v3288_v19 = vpop.eup %3287  ;;  %v2042_v1 = vpop.xlane.xlu1 %2041 }
 0x3c9   : > { %2307 = vst [vmem:[%s4333_s11 + $0x120] sm:$0xff] %v2243_v55  ;;  %v2244_v12 = vmul.f32 %v3288_v19, %v4189_v39  ;;  %3301 = vrsqrt.f32 %v2123_v59  ;;  %v2124_v2 = vmax.f32 %v2042_v1, 1e-24  ;;  %v4575_v1 = vld [vmem:[#allocation19_spill] sm:$0xff] }
 0x3ca   : > { %v3290_v15 = vpop.eup %3289  ;;  %v2044_v57 = vpop.xlane.xlu0 %2043 }
 0x3cb   : > { %2308 = vst [vmem:[%s4333_s11 + $0x128] sm:$0xff] %v2244_v12  ;;  %v2245_v36 = vmul.f32 %v3290_v15, %v4202_v44  ;;  %3303 = vrsqrt.f32 %v2124_v2  ;;  %v2125_v23 = vmax.f32 %v2044_v57, 1e-24 }
 0x3cc   : > { %v3292_v28 = vpop.eup %3291  ;;  %v2046_v27 = vpop.xlane.xlu1 %2045 }
 0x3cd   : > { %2309 = vst [vmem:[%s4333_s11 + $0x130] sm:$0xff] %v2245_v36  ;;  %v2246_v54 = vmul.f32 %v3292_v28, %v4199_v41  ;;  %3305 = vrsqrt.f32 %v2125_v23  ;;  %v2126_v11 = vmax.f32 %v2046_v27, 1e-24  ;;  %v4576_v36 = vld [vmem:[#allocation18_spill] sm:$0xff] }
 0x3ce   : > { %v3294_v39 = vpop.eup %3293  ;;  %v2048_v52 = vpop.xlane.xlu0 %2047 }
 0x3cf   : > { %2310 = vst [vmem:[%s4333_s11 + $0x138] sm:$0xff] %v2246_v54  ;;  %v2247_v40 = vmul.f32 %v3294_v39, %v4212_v58  ;;  %3307 = vrsqrt.f32 %v2126_v11  ;;  %v2127_v63 = vmax.f32 %v2048_v52, 1e-24  ;;  %v4577_v11 = vld [vmem:[#allocation21_spill] sm:$0xff] }
 0x3d0   : > { %v3296_v44 = vpop.eup %3295  ;;  %v2050_v43 = vpop.xlane.xlu1 %2049 }
 0x3d1   : > { %2311 = vst [vmem:[%s4333_s11 + $0x140] sm:$0xff] %v2247_v40  ;;  %v2248_v33 = vmul.f32 %v3296_v44, %v4209_v56  ;;  %3309 = vrsqrt.f32 %v2127_v63  ;;  %v2128_v60 = vmax.f32 %v2050_v43, 1e-24  ;;  %v4578_v44 = vld [vmem:[#allocation20_spill] sm:$0xff] }
 0x3d2   : > { %v3298_v41 = vpop.eup %3297  ;;  %v2052_v14 = vpop.xlane.xlu0 %2051 }
 0x3d3   : > { %2312 = vst [vmem:[%s4333_s11 + $0x148] sm:$0xff] %v2248_v33  ;;  %v2249_v13 = vmul.f32 %v3298_v41, %v4222_v8  ;;  %3311 = vrsqrt.f32 %v2128_v60  ;;  %v2129_v45 = vmax.f32 %v2052_v14, 1e-24  ;;  %v4579_v41 = vld [vmem:[#allocation23_spill] sm:$0xff] }
 0x3d4   : > { %v3300_v58 = vpop.eup %3299  ;;  %v2054_v24 = vpop.xlane.xlu1 %2053 }
 0x3d5   : > { %2313 = vst [vmem:[%s4333_s11 + $0x150] sm:$0xff] %v2249_v13  ;;  %v2250_v34 = vmul.f32 %v3300_v58, %v4219_v4  ;;  %3313 = vrsqrt.f32 %v2129_v45  ;;  %v2130_v61 = vmax.f32 %v2054_v24, 1e-24  ;;  %v4580_v45 = vld [vmem:[#allocation22_spill] sm:$0xff] }
 0x3d6   : > { %v3302_v56 = vpop.eup %3301  ;;  %v2056_v42 = vpop.xlane.xlu0 %2055 }
 0x3d7   : > { %2314 = vst [vmem:[%s4333_s11 + $0x158] sm:$0xff] %v2250_v34  ;;  %v2251_v31 = vmul.f32 %v3302_v56, %v4232_v21  ;;  %3315 = vrsqrt.f32 %v2130_v61  ;;  %v2131_v18 = vmax.f32 %v2056_v42, 1e-24  ;;  %v4581_v34 = vld [vmem:[#allocation25_spill] sm:$0xff]  ;;  %v4582_v42 = vld [vmem:[#allocation24_spill] sm:$0xff] }
 0x3d8   : > { %v3304_v8 = vpop.eup %3303  ;;  %v2058_v3 = vpop.xlane.xlu1 %2057 }
 0x3d9   : > { %2315 = vst [vmem:[%s4333_s11 + $0x160] sm:$0xff] %v2251_v31  ;;  %v2252_v53 = vmul.f32 %v3304_v8, %v4229_v17  ;;  %3317 = vrsqrt.f32 %v2131_v18  ;;  %v2132_v0 = vmax.f32 %v2058_v3, 1e-24  ;;  %v4583_v8 = vld [vmem:[#allocation27_spill] sm:$0xff] }
 0x3da   : > { %v3306_v4 = vpop.eup %3305  ;;  %v2060_v25 = vpop.xlane.xlu0 %2059 }
 0x3db   : > { %2316 = vst [vmem:[%s4333_s11 + $0x168] sm:$0xff] %v2252_v53  ;;  %v2253_v26 = vmul.f32 %v3306_v4, %v4242_v46  ;;  %3319 = vrsqrt.f32 %v2132_v0  ;;  %v2133_v22 = vmax.f32 %v2060_v25, 1e-24  ;;  %v4584_v0 = vld [vmem:[#allocation26_spill] sm:$0xff] }
 0x3dc   : > { %v3308_v21 = vpop.eup %3307  ;;  %v2062_v10 = vpop.xlane.xlu1 %2061 }
 0x3dd   : > { %2317 = vst [vmem:[%s4333_s11 + $0x170] sm:$0xff] %v2253_v26  ;;  %v2254_v20 = vmul.f32 %v3308_v21, %v4239_v38  ;;  %3321 = vrsqrt.f32 %v2133_v22  ;;  %v2134_v50 = vmax.f32 %v2062_v10, 1e-24  ;;  %v4585_v26 = vld [vmem:[#allocation29_spill] sm:$0xff]  ;;  %v4586_v10 = vld [vmem:[#allocation28_spill] sm:$0xff] }
 0x3de   : > { %v3310_v17 = vpop.eup %3309  ;;  %v2064_v62 = vpop.xlane.xlu0 %2063 }
 0x3df   : > { %2318 = vst [vmem:[%s4333_s11 + $0x178] sm:$0xff] %v2254_v20  ;;  %v2255_v51 = vmul.f32 %v3310_v17, %v4252_v7  ;;  %3323 = vrsqrt.f32 %v2134_v50  ;;  %v2135_v9 = vmax.f32 %v2064_v62, 1e-24 }
 0x3e0   : > { %v3312_v46 = vpop.eup %3311  ;;  %v2066_v30 = vpop.xlane.xlu1 %2065 }
 0x3e1   : > { %2319 = vst [vmem:[%s4333_s11 + $0x180] sm:$0xff] %v2255_v51  ;;  %v2256_v37 = vmul.f32 %v3312_v46, %v4572_v48  ;;  %3325 = vrsqrt.f32 %v2135_v9  ;;  %v2136_v49 = vmax.f32 %v2066_v30, 1e-24 }
 0x3e2   : > { %v3314_v38 = vpop.eup %3313  ;;  %v2068_v32 = vpop.xlane.xlu0 %2067 }
 0x3e3   : > { %2320 = vst [vmem:[%s4333_s11 + $0x188] sm:$0xff] %v2256_v37  ;;  %v2257_v35 = vmul.f32 %v3314_v38, %v4573_v6  ;;  %3327 = vrsqrt.f32 %v2136_v49  ;;  %v2137_v47 = vmax.f32 %v2068_v32, 1e-24 }
 0x3e4   : > { %v3316_v7 = vpop.eup %3315  ;;  %v2070_v29 = vpop.xlane.xlu1 %2069 }
 0x3e5   : > { %2321 = vst [vmem:[%s4333_s11 + $0x190] sm:$0xff] %v2257_v35  ;;  %v2258_v16 = vmul.f32 %v3316_v7, %v4574_v5  ;;  %3329 = vrsqrt.f32 %v2137_v47  ;;  %v2138_v55 = vmax.f32 %v2070_v29, 1e-24 }
 0x3e6   : > { %v3318_v59 = vpop.eup %3317  ;;  %v2072_v19 = vpop.xlane.xlu0 %2071 }
 0x3e7   : > { %2322 = vst [vmem:[%s4333_s11 + $0x198] sm:$0xff] %v2258_v16  ;;  %v2259_v12 = vmul.f32 %v3318_v59, %v4575_v1  ;;  %3331 = vrsqrt.f32 %v2138_v55  ;;  %v2139_v2 = vmax.f32 %v2072_v19, 1e-24 }
 0x3e8   : > { %v3320_v15 = vpop.eup %3319  ;;  %v2074_v57 = vpop.xlane.xlu1 %2073 }
 0x3e9   : > { %2323 = vst [vmem:[%s4333_s11 + $0x1a0] sm:$0xff] %v2259_v12  ;;  %v2260_v23 = vmul.f32 %v3320_v15, %v4576_v36  ;;  %3333 = vrsqrt.f32 %v2139_v2  ;;  %v2140_v28 = vmax.f32 %v2074_v57, 1e-24 }
 0x3ea   : > { %v3322_v27 = vpop.eup %3321  ;;  %v2076_v54 = vpop.xlane.xlu0 %2075 }
 0x3eb   : > { %2324 = vst [vmem:[%s4333_s11 + $0x1a8] sm:$0xff] %v2260_v23  ;;  %v2261_v39 = vmul.f32 %v3322_v27, %v4577_v11  ;;  %3335 = vrsqrt.f32 %v2140_v28  ;;  %v2141_v52 = vmax.f32 %v2076_v54, 1e-24 }
 0x3ec   : > { %v3324_v40 = vpop.eup %3323  ;;  %v2078_v63 = vpop.xlane.xlu1 %2077 }
 0x3ed   : > { %2325 = vst [vmem:[%s4333_s11 + $0x1b0] sm:$0xff] %v2261_v39  ;;  %v2262_v43 = vmul.f32 %v3324_v40, %v4578_v44  ;;  %3337 = vrsqrt.f32 %v2141_v52  ;;  %v2142_v33 = vmax.f32 %v2078_v63, 1e-24 }
 0x3ee   : > { %v3326_v60 = vpop.eup %3325 }
 0x3ef   : > { %2326 = vst [vmem:[%s4333_s11 + $0x1b8] sm:$0xff] %v2262_v43  ;;  %v2263_v14 = vmul.f32 %v3326_v60, %v4579_v41  ;;  %3339 = vrsqrt.f32 %v2142_v33 }
 0x3f0   : > { %v3328_v13 = vpop.eup %3327 }
 0x3f1   : > { %2327 = vst [vmem:[%s4333_s11 + $0x1c0] sm:$0xff] %v2263_v14  ;;  %v2264_v58 = vmul.f32 %v3328_v13, %v4580_v45 }
 0x3f2   : > { %v3330_v24 = vpop.eup %3329 }
 0x3f3   : > { %2328 = vst [vmem:[%s4333_s11 + $0x1c8] sm:$0xff] %v2264_v58  ;;  %v2265_v61 = vmul.f32 %v3330_v24, %v4581_v34 }
 0x3f4   : > { %v3332_v56 = vpop.eup %3331 }
 0x3f5   : > { %2329 = vst [vmem:[%s4333_s11 + $0x1d0] sm:$0xff] %v2265_v61  ;;  %v2266_v31 = vmul.f32 %v3332_v56, %v4582_v42 }
 0x3f6   : > { %v3334_v18 = vpop.eup %3333 }
 0x3f7   : > { %2330 = vst [vmem:[%s4333_s11 + $0x1d8] sm:$0xff] %v2266_v31  ;;  %v2267_v3 = vmul.f32 %v3334_v18, %v4583_v8 }
 0x3f8   : > { %v3336_v53 = vpop.eup %3335 }
 0x3f9   : > { %2331 = vst [vmem:[%s4333_s11 + $0x1e0] sm:$0xff] %v2267_v3  ;;  %v2268_v4 = vmul.f32 %v3336_v53, %v4584_v0 }
 0x3fa   : > { %v3338_v25 = vpop.eup %3337 }
 0x3fb   : > { %2332 = vst [vmem:[%s4333_s11 + $0x1e8] sm:$0xff] %v2268_v4  ;;  %v2269_v22 = vmul.f32 %v3338_v25, %v4585_v26 }
 0x3fc   : > { %v3340_v21 = vpop.eup %3339 }
 0x3fd   : > { %2333 = vst [vmem:[%s4333_s11 + $0x1f0] sm:$0xff] %v2269_v22  ;;  %v2270_v20 = vmul.f32 %v3340_v21, %v4586_v10 }
 0x3ff   : > { %2334 = vst [vmem:[%s4333_s11 + $0x1f8] sm:$0xff] %v2270_v20 }
 0x400   : > { %3460 = shalt.err (!%p3457_p10)
}
 0x401   : > { %s3461_s10 = scalar_lea.hbm %s4464_s1, 8192  ;;  %s3465_s29 = scalar_lea.hbm %s4519_s7, 16384 }
 0x402   : > { %p3462_p6 = scmp.ne.s32.totalorder %s4464_s1, %s3461_s10  ;;  %p3466_p3 = scmp.lt.s32.totalorder %s4464_s1, %s4519_s7 }
 0x403   : > { %p3467_p11 = scmp.lt.s32.totalorder %s3465_s29, %s3461_s10 }
 0x404   : > { %p3463_p4 = pnand %p3462_p6, %p4587_p1 }
 0x405   : > { %p3468_p5 = por %p3467_p11, %p3466_p3 }
 0x406   : > { %p3464_p8 = pneg %p3463_p4 }
 0x408   : > { %p3469_p7 = pnand %p3468_p5, %p3464_p8 }
 0x40a   : > { %3472 = shalt.err (!%p3469_p7)
}
 0x40b   : > { %s3528_s18 = smov 128   ;;  %s3529_s23 = smov 8  }
 0x40c   : > { %3146 = dma.vmem_to_hbm [thread:$0]  (%p4587_p1), %s4466_s22, 8192, %s4464_s1, %s2336_s28, %s3528_s18, %s3528_s18, %s3529_s23  }
 0x40d PF: > { %s2364_s16 = sand.u32 1, %s3507_s24   ;;  %p4588_p12 = scmp.ne.s32.totalorder %s4543_s8, 0 }
 0x40e   : > { %p4589_p9 = scmp.ge.s32.totalorder %s3519_s27, 2  ;;  %s2365_s12 = scalar_lea.sflag [#allocation4], %s2364_s16 }
 0x410   : > { %p3163_p13 = pnand %p4589_p9, %p4588_p12 }
 0x412   : > { %p3164_p0 = pneg %p3163_p13 }
 0x414   : > { %3502 = dma.done.wait (%p3164_p0), %s2365_s12, 8192  }
 0x415   : > { %3504 = vsyncadd (%p3164_p0), %s2365_s12, 4294959104  ;;  %p22_p2 = scmp.ge.s32.totalorder %s3659_s14, 4   ;;  %s4590_s24 = smov %s3511_s25 }
 0x416   : > { %s4591_s25 = smov %s3515_s26  ;;  %s4592_s26 = smov %s3669_s17 }
 0x417   : > { %s4593_s27 = smov %s3659_s14  ;;  %24 = sbr.rel (!%p22_p2) target bundleno = 9 (0x9), region = 105 }
 0x41c   :  { %2370 = vsyncpa [#allocation3], 1 }
 0x41d   :  { %2372 = vsyncpa [#allocation3 + $0x1], 1 }
 0x41e   :  { %2373 = vsyncpa [#allocation6], 1 }
 0x41f   :  { %2374 = vsyncpa [#allocation9], 1 }
 0x420   :  { %2375 = vsyncpa [#allocation4], 1 }
 0x421   :  { %2377 = vsyncpa [#allocation4 + $0x1], 1 }

</bundles_post_ra>
